<compile_context>
chip_gen: v5e
topology: v5e:2x2
jax: 0.10.0
libtpu: 0.0.40
codegen_flags: <defaults>
</compile_context>

<pallas_src>
import math
import functools

import jax
import jax.numpy as jnp
from jax.experimental import pallas as pl
from jax.experimental.pallas import tpu as pltpu


# ----------------------------- Pallas kernels ------------------------------

def _attn_sublayer_kernel(xq_ref, xkv_ref, wq_ref, bq_ref, wkv_ref, bkv_ref,
                          wo_ref, bo_ref, g_ref, beta_ref, *rest,
                          n_heads, d_k, scale, has_mask):
    """Fused: LayerNorm(xq + W_o(MHA(W_q xq, W_k xkv, W_v xkv)))."""
    if has_mask:
        mask_ref, o_ref = rest
    else:
        (o_ref,) = rest

    xq = xq_ref[...]                       # (Sq, d_model)
    xkv = xkv_ref[...]                     # (Sk, d_model)
    d_model = n_heads * d_k

    # Projections (lane-dense MXU matmuls over the full d_model / 2*d_model).
    q_all = jnp.dot(xq, wq_ref[...], preferred_element_type=jnp.float32) + bq_ref[...]
    kv = jnp.dot(xkv, wkv_ref[...], preferred_element_type=jnp.float32) + bkv_ref[...]
    k_all = kv[:, :d_model]                # (Sk, d_model)
    v_all = kv[:, d_model:]                # (Sk, d_model)

    # Per-head attention; head split is a static lane slice inside the kernel.
    ctx_heads = []
    for h in range(n_heads):
        lo, hi = h * d_k, (h + 1) * d_k
        q = q_all[:, lo:hi]                # (Sq, dk)
        k = k_all[:, lo:hi]                # (Sk, dk)
        v = v_all[:, lo:hi]                # (Sk, dk)
        s = jnp.dot(q, k.T, preferred_element_type=jnp.float32) * scale
        if has_mask:
            s = s + mask_ref[...]
        s = s - jnp.max(s, axis=-1, keepdims=True)
        p = jnp.exp(s)
        denom = jnp.sum(p, axis=-1, keepdims=True)
        p = p * pl.reciprocal(denom, approx=True)     # EUP slot, ~free
        ctx_heads.append(jnp.dot(p, v, preferred_element_type=jnp.float32))
    ctx = jnp.concatenate(ctx_heads, axis=-1)         # (Sq, d_model)

    attn_out = jnp.dot(ctx, wo_ref[...], preferred_element_type=jnp.float32) + bo_ref[...]

    # Residual + LayerNorm (f32 statistics, eps matches nn.LayerNorm).
    y = xq + attn_out
    mean = jnp.mean(y, axis=-1, keepdims=True)
    var = jnp.mean((y - mean) ** 2, axis=-1, keepdims=True)
    yn = (y - mean) * jax.lax.rsqrt(var + 1e-5)
    o_ref[...] = yn * g_ref[...] + beta_ref[...]


def _ffn_sublayer_kernel(x_ref, w1_ref, b1_ref, w2_ref, b2_ref,
                         g_ref, beta_ref, o_ref):
    """Fused: LayerNorm(x + fc2(relu(fc1(x))))."""
    x = x_ref[...]                         # (TM, d_model)
    h = jnp.dot(x, w1_ref[...], preferred_element_type=jnp.float32) + b1_ref[...]
    h = jnp.maximum(h, 0.0)
    ff = jnp.dot(h, w2_ref[...], preferred_element_type=jnp.float32) + b2_ref[...]
    y = x + ff
    mean = jnp.mean(y, axis=-1, keepdims=True)
    var = jnp.mean((y - mean) ** 2, axis=-1, keepdims=True)
    yn = (y - mean) * jax.lax.rsqrt(var + 1e-5)
    o_ref[...] = yn * g_ref[...] + beta_ref[...]


# ----------------------------- kernel wrappers ------------------------------

def attention_sublayer(xq, xkv, mask, p, ln_g, ln_b, n_heads):
    """xq: (B, Sq, d), xkv: (B, Sk, d), mask: None or (Sq, Sk) additive."""
    b, sq, d = xq.shape
    sk = xkv.shape[1]
    dk = d // n_heads
    has_mask = mask is not None

    kernel = functools.partial(
        _attn_sublayer_kernel,
        n_heads=n_heads, d_k=dk, scale=1.0 / math.sqrt(dk), has_mask=has_mask)

    in_specs = [
        pl.BlockSpec((None, sq, d), lambda i: (i, 0, 0)),   # xq
        pl.BlockSpec((None, sk, d), lambda i: (i, 0, 0)),   # xkv
        pl.BlockSpec((d, d), lambda i: (0, 0)),             # W_q
        pl.BlockSpec((1, d), lambda i: (0, 0)),             # b_q
        pl.BlockSpec((d, 2 * d), lambda i: (0, 0)),         # W_kv (fused K|V)
        pl.BlockSpec((1, 2 * d), lambda i: (0, 0)),         # b_kv
        pl.BlockSpec((d, d), lambda i: (0, 0)),             # W_o
        pl.BlockSpec((1, d), lambda i: (0, 0)),             # b_o
        pl.BlockSpec((1, d), lambda i: (0, 0)),             # ln gamma
        pl.BlockSpec((1, d), lambda i: (0, 0)),             # ln beta
    ]
    args = [xq, xkv,
            p["wq"], p["bq"].reshape(1, d),
            p["wkv"], p["bkv"].reshape(1, 2 * d),
            p["wo"], p["bo"].reshape(1, d),
            ln_g.reshape(1, d), ln_b.reshape(1, d)]
    if has_mask:
        in_specs.append(pl.BlockSpec((sq, sk), lambda i: (0, 0)))
        args.append(mask)

    flops = b * (4 * sq * d * d + 4 * sk * d * d + 4 * sq * sk * d)
    bytes_accessed = 4 * (b * (2 * sq * d + sk * d)
                          + 4 * d * d + 7 * d
                          + (sq * sk if has_mask else 0))
    cost = pl.CostEstimate(flops=flops,
                           transcendentals=b * n_heads * sq * sk,
                           bytes_accessed=bytes_accessed)

    return pl.pallas_call(
        kernel,
        out_shape=jax.ShapeDtypeStruct((b, sq, d), jnp.float32),
        grid=(b,),
        in_specs=in_specs,
        out_specs=pl.BlockSpec((None, sq, d), lambda i: (i, 0, 0)),
        compiler_params=pltpu.CompilerParams(dimension_semantics=("parallel",)),
        cost_estimate=cost,
    )(*args)


def ffn_sublayer(x, p, ln_g, ln_b):
    """x: (B, S, d) -> LayerNorm(x + FFN(x)), row-tiled over B*S."""
    b, s, d = x.shape
    n = b * s
    d_ff = p["fc1_w"].shape[1]
    x2 = x.reshape(n, d)

    # Row tile: whole thing if small, else 512-row tiles (multiple of 8).
    tm = n if n <= 512 else 512
    grid = (pl.cdiv(n, tm),)

    flops = 4 * n * d * d_ff
    bytes_accessed = 4 * (2 * n * d + 2 * d * d_ff + d_ff + 3 * d)
    cost = pl.CostEstimate(flops=flops, transcendentals=0,
                           bytes_accessed=bytes_accessed)

    out = pl.pallas_call(
        _ffn_sublayer_kernel,
        out_shape=jax.ShapeDtypeStruct((n, d), jnp.float32),
        grid=grid,
        in_specs=[
            pl.BlockSpec((tm, d), lambda i: (i, 0)),        # x rows
            pl.BlockSpec((d, d_ff), lambda i: (0, 0)),      # W1
            pl.BlockSpec((1, d_ff), lambda i: (0, 0)),      # b1
            pl.BlockSpec((d_ff, d), lambda i: (0, 0)),      # W2
            pl.BlockSpec((1, d), lambda i: (0, 0)),         # b2
            pl.BlockSpec((1, d), lambda i: (0, 0)),         # ln gamma
            pl.BlockSpec((1, d), lambda i: (0, 0)),         # ln beta
        ],
        out_specs=pl.BlockSpec((tm, d), lambda i: (i, 0)),
        compiler_params=pltpu.CompilerParams(dimension_semantics=("parallel",)),
        cost_estimate=cost,
    )(x2, p["fc1_w"], p["fc1_b"].reshape(1, d_ff),
      p["fc2_w"], p["fc2_b"].reshape(1, d),
      ln_g.reshape(1, d), ln_b.reshape(1, d))
    return out.reshape(b, s, d)


# ------------------------------ model wiring --------------------------------

def encoder_layer(src, p, n_heads, src_mask=None):
    src = attention_sublayer(src, src, src_mask, p["self_attn"],
                             p["ln1_g"], p["ln1_b"], n_heads)
    src = ffn_sublayer(src, p, p["ln2_g"], p["ln2_b"])
    return src


def decoder_layer(tgt, memory, p, n_heads, tgt_mask, memory_mask=None):
    tgt = attention_sublayer(tgt, tgt, tgt_mask, p["self_attn"],
                             p["ln1_g"], p["ln1_b"], n_heads)
    tgt = attention_sublayer(tgt, memory, memory_mask, p["cross_attn"],
                             p["ln2_g"], p["ln2_b"], n_heads)
    tgt = ffn_sublayer(tgt, p, p["ln3_g"], p["ln3_b"])
    return tgt


def positional_encoding(seq_len, d_model):
    position = jnp.arange(seq_len, dtype=jnp.float32)[:, None]
    div_term = jnp.exp(jnp.arange(0, d_model, 2, dtype=jnp.float32)
                       * (-math.log(10000.0) / d_model))
    pe = jnp.zeros((seq_len, d_model), jnp.float32)
    pe = pe.at[:, 0::2].set(jnp.sin(position * div_term))
    pe = pe.at[:, 1::2].set(jnp.cos(position * div_term))
    return pe[None, :, :]


def transformer_forward(params, src, tgt, tgt_mask, n_heads):
    d_model = src.shape[-1]
    # Encoder
    x = src + positional_encoding(src.shape[1], d_model)
    for lp in params["encoder"]:
        x = encoder_layer(x, lp, n_heads, src_mask=None)
    memory = x
    # Decoder
    y = tgt + positional_encoding(tgt.shape[1], d_model)
    for lp in params["decoder"]:
        y = decoder_layer(y, memory, lp, n_heads, tgt_mask, memory_mask=None)
    return y


# ----------------------------- parameter init -------------------------------

def init_linear(key, d_in, d_out):
    k1, k2 = jax.random.split(key)
    bound = 1.0 / math.sqrt(d_in)
    w = jax.random.uniform(k1, (d_in, d_out), jnp.float32, -bound, bound)
    b = jax.random.uniform(k2, (d_out,), jnp.float32, -bound, bound)
    return w, b


def init_mha(key, d_model):
    kq, kk, kv, ko = jax.random.split(key, 4)
    wq, bq = init_linear(kq, d_model, d_model)
    wk, bk = init_linear(kk, d_model, d_model)
    wv, bv = init_linear(kv, d_model, d_model)
    wo, bo = init_linear(ko, d_model, d_model)
    return {
        "wq": wq, "bq": bq,
        # K and V projections fused along the output dim for one MXU pass.
        "wkv": jnp.concatenate([wk, wv], axis=1),
        "bkv": jnp.concatenate([bk, bv], axis=0),
        "wo": wo, "bo": bo,
    }


def init_encoder_layer(key, d_model, d_ff):
    k1, k2, k3 = jax.random.split(key, 3)
    w1, b1 = init_linear(k2, d_model, d_ff)
    w2, b2 = init_linear(k3, d_ff, d_model)
    return {
        "self_attn": init_mha(k1, d_model),
        "fc1_w": w1, "fc1_b": b1, "fc2_w": w2, "fc2_b": b2,
        "ln1_g": jnp.ones((d_model,), jnp.float32), "ln1_b": jnp.zeros((d_model,), jnp.float32),
        "ln2_g": jnp.ones((d_model,), jnp.float32), "ln2_b": jnp.zeros((d_model,), jnp.float32),
    }


def init_decoder_layer(key, d_model, d_ff):
    k1, k2, k3, k4 = jax.random.split(key, 4)
    w1, b1 = init_linear(k3, d_model, d_ff)
    w2, b2 = init_linear(k4, d_ff, d_model)
    return {
        "self_attn": init_mha(k1, d_model),
        "cross_attn": init_mha(k2, d_model),
        "fc1_w": w1, "fc1_b": b1, "fc2_w": w2, "fc2_b": b2,
        "ln1_g": jnp.ones((d_model,), jnp.float32), "ln1_b": jnp.zeros((d_model,), jnp.float32),
        "ln2_g": jnp.ones((d_model,), jnp.float32), "ln2_b": jnp.zeros((d_model,), jnp.float32),
        "ln3_g": jnp.ones((d_model,), jnp.float32), "ln3_b": jnp.zeros((d_model,), jnp.float32),
    }


def init_transformer(key, d_model, n_layers, d_ff):
    keys = jax.random.split(key, 2 * n_layers)
    return {
        "encoder": [init_encoder_layer(keys[i], d_model, d_ff) for i in range(n_layers)],
        "decoder": [init_decoder_layer(keys[n_layers + i], d_model, d_ff) for i in range(n_layers)],
    }


# ---------------------------------- main -------------------------------------

if __name__ == "__main__":
    d_model, n_heads, n_layers, d_ff = 32, 4, 2, 64
    batch, src_len, tgt_len = 2, 8, 8

    key = jax.random.PRNGKey(0)
    k_params, k_src, k_tgt = jax.random.split(key, 3)

    params = init_transformer(k_params, d_model, n_layers, d_ff)
    src = jax.random.normal(k_src, (batch, src_len, d_model), jnp.float32)
    tgt = jax.random.normal(k_tgt, (batch, tgt_len, d_model), jnp.float32)

    # Additive causal mask for decoder self-attention (0 on/below diag, -1e9 above).
    causal = jnp.tril(jnp.ones((tgt_len, tgt_len), jnp.float32))
    tgt_mask = jnp.where(causal > 0, 0.0, -1e9).astype(jnp.float32)

    fwd = jax.jit(functools.partial(transformer_forward, n_heads=n_heads))
    out = fwd(params, src, tgt, tgt_mask)
    out = jax.block_until_ready(out)
    assert out.shape == (batch, tgt_len, d_model)
    assert bool(jnp.all(jnp.isfinite(out)))
    print("KERNEL_OK")
</pallas_src>

<mosaic_0001>
module attributes {stable_mosaic.version = 11 : i64} {
  func.func @_attn_sublayer_kernel(%arg0: i32, %arg1: memref<1x8x32xf32, #tpu.memory_space<vmem>>, %arg2: memref<1x8x32xf32, #tpu.memory_space<vmem>>, %arg3: memref<32x32xf32, #tpu.memory_space<vmem>>, %arg4: memref<1x32xf32, #tpu.memory_space<vmem>>, %arg5: memref<32x64xf32, #tpu.memory_space<vmem>>, %arg6: memref<1x64xf32, #tpu.memory_space<vmem>>, %arg7: memref<32x32xf32, #tpu.memory_space<vmem>>, %arg8: memref<1x32xf32, #tpu.memory_space<vmem>>, %arg9: memref<1x32xf32, #tpu.memory_space<vmem>>, %arg10: memref<1x32xf32, #tpu.memory_space<vmem>>, %arg11: memref<1x8x32xf32, #tpu.memory_space<vmem>>) attributes {dimension_semantics = [#tpu.dimension_semantics<parallel>], iteration_bounds = array<i64: 2>, scalar_prefetch = 0 : i64, scratch_operands = 0 : i64, tpu.core_type = #tpu.core_type<tc>, window_params = [{transform_indices = @transform_0, window_bounds = array<i64: 1, 8, 32>}, {transform_indices = @transform_1, window_bounds = array<i64: 1, 8, 32>}, {pipeline_mode = #tpu.pipeline_mode<synchronous>, transform_indices = @transform_2, window_bounds = array<i64: 32, 32>}, {pipeline_mode = #tpu.pipeline_mode<synchronous>, transform_indices = @transform_3, window_bounds = array<i64: 1, 32>}, {pipeline_mode = #tpu.pipeline_mode<synchronous>, transform_indices = @transform_4, window_bounds = array<i64: 32, 64>}, {pipeline_mode = #tpu.pipeline_mode<synchronous>, transform_indices = @transform_5, window_bounds = array<i64: 1, 64>}, {pipeline_mode = #tpu.pipeline_mode<synchronous>, transform_indices = @transform_6, window_bounds = array<i64: 32, 32>}, {pipeline_mode = #tpu.pipeline_mode<synchronous>, transform_indices = @transform_7, window_bounds = array<i64: 1, 32>}, {pipeline_mode = #tpu.pipeline_mode<synchronous>, transform_indices = @transform_8, window_bounds = array<i64: 1, 32>}, {pipeline_mode = #tpu.pipeline_mode<synchronous>, transform_indices = @transform_9, window_bounds = array<i64: 1, 32>}, {transform_indices = @transform_10, window_bounds = array<i64: 1, 8, 32>}]} {
    %c0 = arith.constant 0 : index
    %c0_0 = arith.constant 0 : index
    %c0_1 = arith.constant 0 : index
    %0 = vector.load %arg1[%c0, %c0_0, %c0_1] : memref<1x8x32xf32, #tpu.memory_space<vmem>>, vector<1x8x32xf32>
    %1 = vector.shape_cast %0 : vector<1x8x32xf32> to vector<8x32xf32>
    %c0_2 = arith.constant 0 : index
    %c0_3 = arith.constant 0 : index
    %c0_4 = arith.constant 0 : index
    %2 = vector.load %arg2[%c0_2, %c0_3, %c0_4] : memref<1x8x32xf32, #tpu.memory_space<vmem>>, vector<1x8x32xf32>
    %3 = vector.shape_cast %2 : vector<1x8x32xf32> to vector<8x32xf32>
    %c0_5 = arith.constant 0 : index
    %c0_6 = arith.constant 0 : index
    %4 = vector.load %arg3[%c0_5, %c0_6] : memref<32x32xf32, #tpu.memory_space<vmem>>, vector<32x32xf32>
    %cst = arith.constant dense<0.000000e+00> : vector<8x32xf32>
    %5 = tpu.matmul %1, %4, %cst {dimension_numbers = #tpu.dot_dimension_numbers<[1], [0], [0], [1], [0, 0, 1, 1], [], []>} : vector<8x32xf32>, vector<32x32xf32>, vector<8x32xf32> -> vector<8x32xf32>
    %c0_7 = arith.constant 0 : index
    %c0_8 = arith.constant 0 : index
    %6 = vector.load %arg4[%c0_7, %c0_8] : memref<1x32xf32, #tpu.memory_space<vmem>>, vector<1x32xf32>
    %7 = vector.broadcast %6 : vector<1x32xf32> to vector<8x32xf32>
    %8 = arith.addf %5, %7 : vector<8x32xf32>
    %c0_9 = arith.constant 0 : index
    %c0_10 = arith.constant 0 : index
    %9 = vector.load %arg5[%c0_9, %c0_10] : memref<32x64xf32, #tpu.memory_space<vmem>>, vector<32x64xf32>
    %cst_11 = arith.constant dense<0.000000e+00> : vector<8x64xf32>
    %10 = tpu.matmul %3, %9, %cst_11 {dimension_numbers = #tpu.dot_dimension_numbers<[1], [0], [0], [1], [0, 0, 1, 1], [], []>} : vector<8x32xf32>, vector<32x64xf32>, vector<8x64xf32> -> vector<8x64xf32>
    %c0_12 = arith.constant 0 : index
    %c0_13 = arith.constant 0 : index
    %11 = vector.load %arg6[%c0_12, %c0_13] : memref<1x64xf32, #tpu.memory_space<vmem>>, vector<1x64xf32>
    %12 = vector.broadcast %11 : vector<1x64xf32> to vector<8x64xf32>
    %13 = arith.addf %10, %12 : vector<8x64xf32>
    %14 = vector.extract_strided_slice %13 {offsets = [0, 0], sizes = [8, 32], strides = [1, 1]} : vector<8x64xf32> to vector<8x32xf32>
    %15 = vector.extract_strided_slice %13 {offsets = [0, 32], sizes = [8, 32], strides = [1, 1]} : vector<8x64xf32> to vector<8x32xf32>
    %16 = vector.extract_strided_slice %8 {offsets = [0, 0], sizes = [8, 8], strides = [1, 1]} : vector<8x32xf32> to vector<8x8xf32>
    %17 = vector.extract_strided_slice %14 {offsets = [0, 0], sizes = [8, 8], strides = [1, 1]} : vector<8x32xf32> to vector<8x8xf32>
    %18 = vector.extract_strided_slice %15 {offsets = [0, 0], sizes = [8, 8], strides = [1, 1]} : vector<8x32xf32> to vector<8x8xf32>
    %19 = tpu.transpose %17, [1, 0] : vector<8x8xf32> -> vector<8x8xf32>
    %cst_14 = arith.constant dense<0.000000e+00> : vector<8x8xf32>
    %20 = tpu.matmul %16, %19, %cst_14 {dimension_numbers = #tpu.dot_dimension_numbers<[1], [0], [0], [1], [0, 0, 1, 1], [], []>} : vector<8x8xf32>, vector<8x8xf32>, vector<8x8xf32> -> vector<8x8xf32>
    %cst_15 = arith.constant 0.353553385 : f32
    %21 = vector.broadcast %cst_15 : f32 to vector<8x8xf32>
    %22 = arith.mulf %20, %21 : vector<8x8xf32>
    %cst_16 = arith.constant dense<0xFF800000> : vector<8xf32>
    %23 = vector.multi_reduction <maximumf>, %22, %cst_16 [1] : vector<8x8xf32> to vector<8xf32>
    %24 = vector.shape_cast %23 : vector<8xf32> to vector<8x1xf32>
    %25 = vector.broadcast %24 : vector<8x1xf32> to vector<8x8xf32>
    %26 = arith.subf %22, %25 : vector<8x8xf32>
    %27 = math.exp %26 : vector<8x8xf32>
    %cst_17 = arith.constant dense<0.000000e+00> : vector<8xf32>
    %28 = vector.multi_reduction <add>, %27, %cst_17 [1] : vector<8x8xf32> to vector<8xf32>
    %29 = vector.shape_cast %28 : vector<8xf32> to vector<8x1xf32>
    %30 = tpu.reciprocal %29 {approx = true} : vector<8x1xf32> -> vector<8x1xf32>
    %31 = vector.broadcast %30 : vector<8x1xf32> to vector<8x8xf32>
    %32 = arith.mulf %27, %31 : vector<8x8xf32>
    %cst_18 = arith.constant dense<0.000000e+00> : vector<8x8xf32>
    %33 = tpu.matmul %32, %18, %cst_18 {dimension_numbers = #tpu.dot_dimension_numbers<[1], [0], [0], [1], [0, 0, 1, 1], [], []>} : vector<8x8xf32>, vector<8x8xf32>, vector<8x8xf32> -> vector<8x8xf32>
    %34 = vector.extract_strided_slice %8 {offsets = [0, 8], sizes = [8, 8], strides = [1, 1]} : vector<8x32xf32> to vector<8x8xf32>
    %35 = vector.extract_strided_slice %14 {offsets = [0, 8], sizes = [8, 8], strides = [1, 1]} : vector<8x32xf32> to vector<8x8xf32>
    %36 = vector.extract_strided_slice %15 {offsets = [0, 8], sizes = [8, 8], strides = [1, 1]} : vector<8x32xf32> to vector<8x8xf32>
    %37 = tpu.transpose %35, [1, 0] : vector<8x8xf32> -> vector<8x8xf32>
    %cst_19 = arith.constant dense<0.000000e+00> : vector<8x8xf32>
    %38 = tpu.matmul %34, %37, %cst_19 {dimension_numbers = #tpu.dot_dimension_numbers<[1], [0], [0], [1], [0, 0, 1, 1], [], []>} : vector<8x8xf32>, vector<8x8xf32>, vector<8x8xf32> -> vector<8x8xf32>
    %cst_20 = arith.constant 0.353553385 : f32
    %39 = vector.broadcast %cst_20 : f32 to vector<8x8xf32>
    %40 = arith.mulf %38, %39 : vector<8x8xf32>
    %cst_21 = arith.constant dense<0xFF800000> : vector<8xf32>
    %41 = vector.multi_reduction <maximumf>, %40, %cst_21 [1] : vector<8x8xf32> to vector<8xf32>
    %42 = vector.shape_cast %41 : vector<8xf32> to vector<8x1xf32>
    %43 = vector.broadcast %42 : vector<8x1xf32> to vector<8x8xf32>
    %44 = arith.subf %40, %43 : vector<8x8xf32>
    %45 = math.exp %44 : vector<8x8xf32>
    %cst_22 = arith.constant dense<0.000000e+00> : vector<8xf32>
    %46 = vector.multi_reduction <add>, %45, %cst_22 [1] : vector<8x8xf32> to vector<8xf32>
    %47 = vector.shape_cast %46 : vector<8xf32> to vector<8x1xf32>
    %48 = tpu.reciprocal %47 {approx = true} : vector<8x1xf32> -> vector<8x1xf32>
    %49 = vector.broadcast %48 : vector<8x1xf32> to vector<8x8xf32>
    %50 = arith.mulf %45, %49 : vector<8x8xf32>
    %cst_23 = arith.constant dense<0.000000e+00> : vector<8x8xf32>
    %51 = tpu.matmul %50, %36, %cst_23 {dimension_numbers = #tpu.dot_dimension_numbers<[1], [0], [0], [1], [0, 0, 1, 1], [], []>} : vector<8x8xf32>, vector<8x8xf32>, vector<8x8xf32> -> vector<8x8xf32>
    %52 = vector.extract_strided_slice %8 {offsets = [0, 16], sizes = [8, 8], strides = [1, 1]} : vector<8x32xf32> to vector<8x8xf32>
    %53 = vector.extract_strided_slice %14 {offsets = [0, 16], sizes = [8, 8], strides = [1, 1]} : vector<8x32xf32> to vector<8x8xf32>
    %54 = vector.extract_strided_slice %15 {offsets = [0, 16], sizes = [8, 8], strides = [1, 1]} : vector<8x32xf32> to vector<8x8xf32>
    %55 = tpu.transpose %53, [1, 0] : vector<8x8xf32> -> vector<8x8xf32>
    %cst_24 = arith.constant dense<0.000000e+00> : vector<8x8xf32>
    %56 = tpu.matmul %52, %55, %cst_24 {dimension_numbers = #tpu.dot_dimension_numbers<[1], [0], [0], [1], [0, 0, 1, 1], [], []>} : vector<8x8xf32>, vector<8x8xf32>, vector<8x8xf32> -> vector<8x8xf32>
    %cst_25 = arith.constant 0.353553385 : f32
    %57 = vector.broadcast %cst_25 : f32 to vector<8x8xf32>
    %58 = arith.mulf %56, %57 : vector<8x8xf32>
    %cst_26 = arith.constant dense<0xFF800000> : vector<8xf32>
    %59 = vector.multi_reduction <maximumf>, %58, %cst_26 [1] : vector<8x8xf32> to vector<8xf32>
    %60 = vector.shape_cast %59 : vector<8xf32> to vector<8x1xf32>
    %61 = vector.broadcast %60 : vector<8x1xf32> to vector<8x8xf32>
    %62 = arith.subf %58, %61 : vector<8x8xf32>
    %63 = math.exp %62 : vector<8x8xf32>
    %cst_27 = arith.constant dense<0.000000e+00> : vector<8xf32>
    %64 = vector.multi_reduction <add>, %63, %cst_27 [1] : vector<8x8xf32> to vector<8xf32>
    %65 = vector.shape_cast %64 : vector<8xf32> to vector<8x1xf32>
    %66 = tpu.reciprocal %65 {approx = true} : vector<8x1xf32> -> vector<8x1xf32>
    %67 = vector.broadcast %66 : vector<8x1xf32> to vector<8x8xf32>
    %68 = arith.mulf %63, %67 : vector<8x8xf32>
    %cst_28 = arith.constant dense<0.000000e+00> : vector<8x8xf32>
    %69 = tpu.matmul %68, %54, %cst_28 {dimension_numbers = #tpu.dot_dimension_numbers<[1], [0], [0], [1], [0, 0, 1, 1], [], []>} : vector<8x8xf32>, vector<8x8xf32>, vector<8x8xf32> -> vector<8x8xf32>
    %70 = vector.extract_strided_slice %8 {offsets = [0, 24], sizes = [8, 8], strides = [1, 1]} : vector<8x32xf32> to vector<8x8xf32>
    %71 = vector.extract_strided_slice %14 {offsets = [0, 24], sizes = [8, 8], strides = [1, 1]} : vector<8x32xf32> to vector<8x8xf32>
    %72 = vector.extract_strided_slice %15 {offsets = [0, 24], sizes = [8, 8], strides = [1, 1]} : vector<8x32xf32> to vector<8x8xf32>
    %73 = tpu.transpose %71, [1, 0] : vector<8x8xf32> -> vector<8x8xf32>
    %cst_29 = arith.constant dense<0.000000e+00> : vector<8x8xf32>
    %74 = tpu.matmul %70, %73, %cst_29 {dimension_numbers = #tpu.dot_dimension_numbers<[1], [0], [0], [1], [0, 0, 1, 1], [], []>} : vector<8x8xf32>, vector<8x8xf32>, vector<8x8xf32> -> vector<8x8xf32>
    %cst_30 = arith.constant 0.353553385 : f32
    %75 = vector.broadcast %cst_30 : f32 to vector<8x8xf32>
    %76 = arith.mulf %74, %75 : vector<8x8xf32>
    %cst_31 = arith.constant dense<0xFF800000> : vector<8xf32>
    %77 = vector.multi_reduction <maximumf>, %76, %cst_31 [1] : vector<8x8xf32> to vector<8xf32>
    %78 = vector.shape_cast %77 : vector<8xf32> to vector<8x1xf32>
    %79 = vector.broadcast %78 : vector<8x1xf32> to vector<8x8xf32>
    %80 = arith.subf %76, %79 : vector<8x8xf32>
    %81 = math.exp %80 : vector<8x8xf32>
    %cst_32 = arith.constant dense<0.000000e+00> : vector<8xf32>
    %82 = vector.multi_reduction <add>, %81, %cst_32 [1] : vector<8x8xf32> to vector<8xf32>
    %83 = vector.shape_cast %82 : vector<8xf32> to vector<8x1xf32>
    %84 = tpu.reciprocal %83 {approx = true} : vector<8x1xf32> -> vector<8x1xf32>
    %85 = vector.broadcast %84 : vector<8x1xf32> to vector<8x8xf32>
    %86 = arith.mulf %81, %85 : vector<8x8xf32>
    %cst_33 = arith.constant dense<0.000000e+00> : vector<8x8xf32>
    %87 = tpu.matmul %86, %72, %cst_33 {dimension_numbers = #tpu.dot_dimension_numbers<[1], [0], [0], [1], [0, 0, 1, 1], [], []>} : vector<8x8xf32>, vector<8x8xf32>, vector<8x8xf32> -> vector<8x8xf32>
    %88 = tpu.concatenate %33, %51, %69, %87 in 1 : vector<8x8xf32>, vector<8x8xf32>, vector<8x8xf32>, vector<8x8xf32> -> vector<8x32xf32>
    %c0_34 = arith.constant 0 : index
    %c0_35 = arith.constant 0 : index
    %89 = vector.load %arg7[%c0_34, %c0_35] : memref<32x32xf32, #tpu.memory_space<vmem>>, vector<32x32xf32>
    %cst_36 = arith.constant dense<0.000000e+00> : vector<8x32xf32>
    %90 = tpu.matmul %88, %89, %cst_36 {dimension_numbers = #tpu.dot_dimension_numbers<[1], [0], [0], [1], [0, 0, 1, 1], [], []>} : vector<8x32xf32>, vector<32x32xf32>, vector<8x32xf32> -> vector<8x32xf32>
    %c0_37 = arith.constant 0 : index
    %c0_38 = arith.constant 0 : index
    %91 = vector.load %arg8[%c0_37, %c0_38] : memref<1x32xf32, #tpu.memory_space<vmem>>, vector<1x32xf32>
    %92 = vector.broadcast %91 : vector<1x32xf32> to vector<8x32xf32>
    %93 = arith.addf %90, %92 : vector<8x32xf32>
    %94 = arith.addf %1, %93 : vector<8x32xf32>
    %cst_39 = arith.constant dense<0.000000e+00> : vector<8xf32>
    %95 = vector.multi_reduction <add>, %94, %cst_39 [1] : vector<8x32xf32> to vector<8xf32>
    %96 = vector.shape_cast %95 : vector<8xf32> to vector<8x1xf32>
    %cst_40 = arith.constant 3.200000e+01 : f32
    %97 = vector.broadcast %cst_40 : f32 to vector<8x1xf32>
    %98 = arith.divf %96, %97 : vector<8x1xf32>
    %99 = vector.broadcast %98 : vector<8x1xf32> to vector<8x32xf32>
    %100 = arith.subf %94, %99 : vector<8x32xf32>
    %101 = arith.mulf %100, %100 : vector<8x32xf32>
    %cst_41 = arith.constant dense<0.000000e+00> : vector<8xf32>
    %102 = vector.multi_reduction <add>, %101, %cst_41 [1] : vector<8x32xf32> to vector<8xf32>
    %103 = vector.shape_cast %102 : vector<8xf32> to vector<8x1xf32>
    %cst_42 = arith.constant 3.200000e+01 : f32
    %104 = vector.broadcast %cst_42 : f32 to vector<8x1xf32>
    %105 = arith.divf %103, %104 : vector<8x1xf32>
    %106 = vector.broadcast %98 : vector<8x1xf32> to vector<8x32xf32>
    %107 = arith.subf %94, %106 : vector<8x32xf32>
    %cst_43 = arith.constant 9.99999974E-6 : f32
    %108 = vector.broadcast %cst_43 : f32 to vector<8x1xf32>
    %109 = arith.addf %105, %108 : vector<8x1xf32>
    %110 = math.rsqrt %109 : vector<8x1xf32>
    %111 = vector.broadcast %110 : vector<8x1xf32> to vector<8x32xf32>
    %112 = arith.mulf %107, %111 : vector<8x32xf32>
    %c0_44 = arith.constant 0 : index
    %c0_45 = arith.constant 0 : index
    %113 = vector.load %arg9[%c0_44, %c0_45] : memref<1x32xf32, #tpu.memory_space<vmem>>, vector<1x32xf32>
    %114 = vector.broadcast %113 : vector<1x32xf32> to vector<8x32xf32>
    %115 = arith.mulf %112, %114 : vector<8x32xf32>
    %c0_46 = arith.constant 0 : index
    %c0_47 = arith.constant 0 : index
    %116 = vector.load %arg10[%c0_46, %c0_47] : memref<1x32xf32, #tpu.memory_space<vmem>>, vector<1x32xf32>
    %117 = vector.broadcast %116 : vector<1x32xf32> to vector<8x32xf32>
    %118 = arith.addf %115, %117 : vector<8x32xf32>
    %c0_48 = arith.constant 0 : index
    %c0_49 = arith.constant 0 : index
    %c0_50 = arith.constant 0 : index
    %119 = vector.load %arg11[%c0_48, %c0_49, %c0_50] : memref<1x8x32xf32, #tpu.memory_space<vmem>>, vector<1x8x32xf32>
    %120 = vector.shape_cast %119 : vector<1x8x32xf32> to vector<8x32xf32>
    %121 = vector.shape_cast %118 : vector<8x32xf32> to vector<1x8x32xf32>
    tpu.vector_store %arg11[%c0_48, %c0_49, %c0_50], %121 {strides = array<i32>} : memref<1x8x32xf32, #tpu.memory_space<vmem>>, vector<1x8x32xf32>,
    return
  }
  func.func @transform_0(%arg0: i32) -> (i32, i32, i32) {
    %c0_i32 = arith.constant 0 : i32
    %c0_i32_0 = arith.constant 0 : i32
    %c0_i32_1 = arith.constant 0 : i32
    return %arg0, %c0_i32, %c0_i32_0 : i32, i32, i32
  }
  func.func @transform_1(%arg0: i32) -> (i32, i32, i32) {
    %c0_i32 = arith.constant 0 : i32
    %c0_i32_0 = arith.constant 0 : i32
    %c0_i32_1 = arith.constant 0 : i32
    return %arg0, %c0_i32, %c0_i32_0 : i32, i32, i32
  }
  func.func @transform_2(%arg0: i32) -> (i32, i32) {
    %c0_i32 = arith.constant 0 : i32
    %c0_i32_0 = arith.constant 0 : i32
    %c0_i32_1 = arith.constant 0 : i32
    return %c0_i32, %c0_i32_0 : i32, i32
  }
  func.func @transform_3(%arg0: i32) -> (i32, i32) {
    %c0_i32 = arith.constant 0 : i32
    %c0_i32_0 = arith.constant 0 : i32
    %c0_i32_1 = arith.constant 0 : i32
    return %c0_i32, %c0_i32_0 : i32, i32
  }
  func.func @transform_4(%arg0: i32) -> (i32, i32) {
    %c0_i32 = arith.constant 0 : i32
    %c0_i32_0 = arith.constant 0 : i32
    %c0_i32_1 = arith.constant 0 : i32
    return %c0_i32, %c0_i32_0 : i32, i32
  }
  func.func @transform_5(%arg0: i32) -> (i32, i32) {
    %c0_i32 = arith.constant 0 : i32
    %c0_i32_0 = arith.constant 0 : i32
    %c0_i32_1 = arith.constant 0 : i32
    return %c0_i32, %c0_i32_0 : i32, i32
  }
  func.func @transform_6(%arg0: i32) -> (i32, i32) {
    %c0_i32 = arith.constant 0 : i32
    %c0_i32_0 = arith.constant 0 : i32
    %c0_i32_1 = arith.constant 0 : i32
    return %c0_i32, %c0_i32_0 : i32, i32
  }
  func.func @transform_7(%arg0: i32) -> (i32, i32) {
    %c0_i32 = arith.constant 0 : i32
    %c0_i32_0 = arith.constant 0 : i32
    %c0_i32_1 = arith.constant 0 : i32
    return %c0_i32, %c0_i32_0 : i32, i32
  }
  func.func @transform_8(%arg0: i32) -> (i32, i32) {
    %c0_i32 = arith.constant 0 : i32
    %c0_i32_0 = arith.constant 0 : i32
    %c0_i32_1 = arith.constant 0 : i32
    return %c0_i32, %c0_i32_0 : i32, i32
  }
  func.func @transform_9(%arg0: i32) -> (i32, i32) {
    %c0_i32 = arith.constant 0 : i32
    %c0_i32_0 = arith.constant 0 : i32
    %c0_i32_1 = arith.constant 0 : i32
    return %c0_i32, %c0_i32_0 : i32, i32
  }
  func.func @transform_10(%arg0: i32) -> (i32, i32, i32) {
    %c0_i32 = arith.constant 0 : i32
    %c0_i32_0 = arith.constant 0 : i32
    %c0_i32_1 = arith.constant 0 : i32
    return %arg0, %c0_i32, %c0_i32_0 : i32, i32, i32
  }
}

module attributes {stable_mosaic.version = 11 : i64} {
  func.func @_attn_sublayer_kernel(%arg0: i32, %arg1: memref<1x8x32xf32, #tpu.memory_space<vmem>>, %arg2: memref<1x8x32xf32, #tpu.memory_space<vmem>>, %arg3: memref<32x32xf32, #tpu.memory_space<vmem>>, %arg4: memref<1x32xf32, #tpu.memory_space<vmem>>, %arg5: memref<32x64xf32, #tpu.memory_space<vmem>>, %arg6: memref<1x64xf32, #tpu.memory_space<vmem>>, %arg7: memref<32x32xf32, #tpu.memory_space<vmem>>, %arg8: memref<1x32xf32, #tpu.memory_space<vmem>>, %arg9: memref<1x32xf32, #tpu.memory_space<vmem>>, %arg10: memref<1x32xf32, #tpu.memory_space<vmem>>, %arg11: memref<8x8xf32, #tpu.memory_space<vmem>>, %arg12: memref<1x8x32xf32, #tpu.memory_space<vmem>>) attributes {dimension_semantics = [#tpu.dimension_semantics<parallel>], iteration_bounds = array<i64: 2>, scalar_prefetch = 0 : i64, scratch_operands = 0 : i64, tpu.core_type = #tpu.core_type<tc>, window_params = [{transform_indices = @transform_0, window_bounds = array<i64: 1, 8, 32>}, {transform_indices = @transform_1, window_bounds = array<i64: 1, 8, 32>}, {pipeline_mode = #tpu.pipeline_mode<synchronous>, transform_indices = @transform_2, window_bounds = array<i64: 32, 32>}, {pipeline_mode = #tpu.pipeline_mode<synchronous>, transform_indices = @transform_3, window_bounds = array<i64: 1, 32>}, {pipeline_mode = #tpu.pipeline_mode<synchronous>, transform_indices = @transform_4, window_bounds = array<i64: 32, 64>}, {pipeline_mode = #tpu.pipeline_mode<synchronous>, transform_indices = @transform_5, window_bounds = array<i64: 1, 64>}, {pipeline_mode = #tpu.pipeline_mode<synchronous>, transform_indices = @transform_6, window_bounds = array<i64: 32, 32>}, {pipeline_mode = #tpu.pipeline_mode<synchronous>, transform_indices = @transform_7, window_bounds = array<i64: 1, 32>}, {pipeline_mode = #tpu.pipeline_mode<synchronous>, transform_indices = @transform_8, window_bounds = array<i64: 1, 32>}, {pipeline_mode = #tpu.pipeline_mode<synchronous>, transform_indices = @transform_9, window_bounds = array<i64: 1, 32>}, {pipeline_mode = #tpu.pipeline_mode<synchronous>, transform_indices = @transform_10, window_bounds = array<i64: 8, 8>}, {transform_indices = @transform_11, window_bounds = array<i64: 1, 8, 32>}]} {
    %c0 = arith.constant 0 : index
    %c0_0 = arith.constant 0 : index
    %c0_1 = arith.constant 0 : index
    %0 = vector.load %arg1[%c0, %c0_0, %c0_1] : memref<1x8x32xf32, #tpu.memory_space<vmem>>, vector<1x8x32xf32>
    %1 = vector.shape_cast %0 : vector<1x8x32xf32> to vector<8x32xf32>
    %c0_2 = arith.constant 0 : index
    %c0_3 = arith.constant 0 : index
    %c0_4 = arith.constant 0 : index
    %2 = vector.load %arg2[%c0_2, %c0_3, %c0_4] : memref<1x8x32xf32, #tpu.memory_space<vmem>>, vector<1x8x32xf32>
    %3 = vector.shape_cast %2 : vector<1x8x32xf32> to vector<8x32xf32>
    %c0_5 = arith.constant 0 : index
    %c0_6 = arith.constant 0 : index
    %4 = vector.load %arg3[%c0_5, %c0_6] : memref<32x32xf32, #tpu.memory_space<vmem>>, vector<32x32xf32>
    %cst = arith.constant dense<0.000000e+00> : vector<8x32xf32>
    %5 = tpu.matmul %1, %4, %cst {dimension_numbers = #tpu.dot_dimension_numbers<[1], [0], [0], [1], [0, 0, 1, 1], [], []>} : vector<8x32xf32>, vector<32x32xf32>, vector<8x32xf32> -> vector<8x32xf32>
    %c0_7 = arith.constant 0 : index
    %c0_8 = arith.constant 0 : index
    %6 = vector.load %arg4[%c0_7, %c0_8] : memref<1x32xf32, #tpu.memory_space<vmem>>, vector<1x32xf32>
    %7 = vector.broadcast %6 : vector<1x32xf32> to vector<8x32xf32>
    %8 = arith.addf %5, %7 : vector<8x32xf32>
    %c0_9 = arith.constant 0 : index
    %c0_10 = arith.constant 0 : index
    %9 = vector.load %arg5[%c0_9, %c0_10] : memref<32x64xf32, #tpu.memory_space<vmem>>, vector<32x64xf32>
    %cst_11 = arith.constant dense<0.000000e+00> : vector<8x64xf32>
    %10 = tpu.matmul %3, %9, %cst_11 {dimension_numbers = #tpu.dot_dimension_numbers<[1], [0], [0], [1], [0, 0, 1, 1], [], []>} : vector<8x32xf32>, vector<32x64xf32>, vector<8x64xf32> -> vector<8x64xf32>
    %c0_12 = arith.constant 0 : index
    %c0_13 = arith.constant 0 : index
    %11 = vector.load %arg6[%c0_12, %c0_13] : memref<1x64xf32, #tpu.memory_space<vmem>>, vector<1x64xf32>
    %12 = vector.broadcast %11 : vector<1x64xf32> to vector<8x64xf32>
    %13 = arith.addf %10, %12 : vector<8x64xf32>
    %14 = vector.extract_strided_slice %13 {offsets = [0, 0], sizes = [8, 32], strides = [1, 1]} : vector<8x64xf32> to vector<8x32xf32>
    %15 = vector.extract_strided_slice %13 {offsets = [0, 32], sizes = [8, 32], strides = [1, 1]} : vector<8x64xf32> to vector<8x32xf32>
    %16 = vector.extract_strided_slice %8 {offsets = [0, 0], sizes = [8, 8], strides = [1, 1]} : vector<8x32xf32> to vector<8x8xf32>
    %17 = vector.extract_strided_slice %14 {offsets = [0, 0], sizes = [8, 8], strides = [1, 1]} : vector<8x32xf32> to vector<8x8xf32>
    %18 = vector.extract_strided_slice %15 {offsets = [0, 0], sizes = [8, 8], strides = [1, 1]} : vector<8x32xf32> to vector<8x8xf32>
    %19 = tpu.transpose %17, [1, 0] : vector<8x8xf32> -> vector<8x8xf32>
    %cst_14 = arith.constant dense<0.000000e+00> : vector<8x8xf32>
    %20 = tpu.matmul %16, %19, %cst_14 {dimension_numbers = #tpu.dot_dimension_numbers<[1], [0], [0], [1], [0, 0, 1, 1], [], []>} : vector<8x8xf32>, vector<8x8xf32>, vector<8x8xf32> -> vector<8x8xf32>
    %cst_15 = arith.constant 0.353553385 : f32
    %21 = vector.broadcast %cst_15 : f32 to vector<8x8xf32>
    %22 = arith.mulf %20, %21 : vector<8x8xf32>
    %c0_16 = arith.constant 0 : index
    %c0_17 = arith.constant 0 : index
    %23 = vector.load %arg11[%c0_16, %c0_17] : memref<8x8xf32, #tpu.memory_space<vmem>>, vector<8x8xf32>
    %24 = arith.addf %22, %23 : vector<8x8xf32>
    %cst_18 = arith.constant dense<0xFF800000> : vector<8xf32>
    %25 = vector.multi_reduction <maximumf>, %24, %cst_18 [1] : vector<8x8xf32> to vector<8xf32>
    %26 = vector.shape_cast %25 : vector<8xf32> to vector<8x1xf32>
    %27 = vector.broadcast %26 : vector<8x1xf32> to vector<8x8xf32>
    %28 = arith.subf %24, %27 : vector<8x8xf32>
    %29 = math.exp %28 : vector<8x8xf32>
    %cst_19 = arith.constant dense<0.000000e+00> : vector<8xf32>
    %30 = vector.multi_reduction <add>, %29, %cst_19 [1] : vector<8x8xf32> to vector<8xf32>
    %31 = vector.shape_cast %30 : vector<8xf32> to vector<8x1xf32>
    %32 = tpu.reciprocal %31 {approx = true} : vector<8x1xf32> -> vector<8x1xf32>
    %33 = vector.broadcast %32 : vector<8x1xf32> to vector<8x8xf32>
    %34 = arith.mulf %29, %33 : vector<8x8xf32>
    %cst_20 = arith.constant dense<0.000000e+00> : vector<8x8xf32>
    %35 = tpu.matmul %34, %18, %cst_20 {dimension_numbers = #tpu.dot_dimension_numbers<[1], [0], [0], [1], [0, 0, 1, 1], [], []>} : vector<8x8xf32>, vector<8x8xf32>, vector<8x8xf32> -> vector<8x8xf32>
    %36 = vector.extract_strided_slice %8 {offsets = [0, 8], sizes = [8, 8], strides = [1, 1]} : vector<8x32xf32> to vector<8x8xf32>
    %37 = vector.extract_strided_slice %14 {offsets = [0, 8], sizes = [8, 8], strides = [1, 1]} : vector<8x32xf32> to vector<8x8xf32>
    %38 = vector.extract_strided_slice %15 {offsets = [0, 8], sizes = [8, 8], strides = [1, 1]} : vector<8x32xf32> to vector<8x8xf32>
    %39 = tpu.transpose %37, [1, 0] : vector<8x8xf32> -> vector<8x8xf32>
    %cst_21 = arith.constant dense<0.000000e+00> : vector<8x8xf32>
    %40 = tpu.matmul %36, %39, %cst_21 {dimension_numbers = #tpu.dot_dimension_numbers<[1], [0], [0], [1], [0, 0, 1, 1], [], []>} : vector<8x8xf32>, vector<8x8xf32>, vector<8x8xf32> -> vector<8x8xf32>
    %cst_22 = arith.constant 0.353553385 : f32
    %41 = vector.broadcast %cst_22 : f32 to vector<8x8xf32>
    %42 = arith.mulf %40, %41 : vector<8x8xf32>
    %c0_23 = arith.constant 0 : index
    %c0_24 = arith.constant 0 : index
    %43 = vector.load %arg11[%c0_23, %c0_24] : memref<8x8xf32, #tpu.memory_space<vmem>>, vector<8x8xf32>
    %44 = arith.addf %42, %43 : vector<8x8xf32>
    %cst_25 = arith.constant dense<0xFF800000> : vector<8xf32>
    %45 = vector.multi_reduction <maximumf>, %44, %cst_25 [1] : vector<8x8xf32> to vector<8xf32>
    %46 = vector.shape_cast %45 : vector<8xf32> to vector<8x1xf32>
    %47 = vector.broadcast %46 : vector<8x1xf32> to vector<8x8xf32>
    %48 = arith.subf %44, %47 : vector<8x8xf32>
    %49 = math.exp %48 : vector<8x8xf32>
    %cst_26 = arith.constant dense<0.000000e+00> : vector<8xf32>
    %50 = vector.multi_reduction <add>, %49, %cst_26 [1] : vector<8x8xf32> to vector<8xf32>
    %51 = vector.shape_cast %50 : vector<8xf32> to vector<8x1xf32>
    %52 = tpu.reciprocal %51 {approx = true} : vector<8x1xf32> -> vector<8x1xf32>
    %53 = vector.broadcast %52 : vector<8x1xf32> to vector<8x8xf32>
    %54 = arith.mulf %49, %53 : vector<8x8xf32>
    %cst_27 = arith.constant dense<0.000000e+00> : vector<8x8xf32>
    %55 = tpu.matmul %54, %38, %cst_27 {dimension_numbers = #tpu.dot_dimension_numbers<[1], [0], [0], [1], [0, 0, 1, 1], [], []>} : vector<8x8xf32>, vector<8x8xf32>, vector<8x8xf32> -> vector<8x8xf32>
    %56 = vector.extract_strided_slice %8 {offsets = [0, 16], sizes = [8, 8], strides = [1, 1]} : vector<8x32xf32> to vector<8x8xf32>
    %57 = vector.extract_strided_slice %14 {offsets = [0, 16], sizes = [8, 8], strides = [1, 1]} : vector<8x32xf32> to vector<8x8xf32>
    %58 = vector.extract_strided_slice %15 {offsets = [0, 16], sizes = [8, 8], strides = [1, 1]} : vector<8x32xf32> to vector<8x8xf32>
    %59 = tpu.transpose %57, [1, 0] : vector<8x8xf32> -> vector<8x8xf32>
    %cst_28 = arith.constant dense<0.000000e+00> : vector<8x8xf32>
    %60 = tpu.matmul %56, %59, %cst_28 {dimension_numbers = #tpu.dot_dimension_numbers<[1], [0], [0], [1], [0, 0, 1, 1], [], []>} : vector<8x8xf32>, vector<8x8xf32>, vector<8x8xf32> -> vector<8x8xf32>
    %cst_29 = arith.constant 0.353553385 : f32
    %61 = vector.broadcast %cst_29 : f32 to vector<8x8xf32>
    %62 = arith.mulf %60, %61 : vector<8x8xf32>
    %c0_30 = arith.constant 0 : index
    %c0_31 = arith.constant 0 : index
    %63 = vector.load %arg11[%c0_30, %c0_31] : memref<8x8xf32, #tpu.memory_space<vmem>>, vector<8x8xf32>
    %64 = arith.addf %62, %63 : vector<8x8xf32>
    %cst_32 = arith.constant dense<0xFF800000> : vector<8xf32>
    %65 = vector.multi_reduction <maximumf>, %64, %cst_32 [1] : vector<8x8xf32> to vector<8xf32>
    %66 = vector.shape_cast %65 : vector<8xf32> to vector<8x1xf32>
    %67 = vector.broadcast %66 : vector<8x1xf32> to vector<8x8xf32>
    %68 = arith.subf %64, %67 : vector<8x8xf32>
    %69 = math.exp %68 : vector<8x8xf32>
    %cst_33 = arith.constant dense<0.000000e+00> : vector<8xf32>
    %70 = vector.multi_reduction <add>, %69, %cst_33 [1] : vector<8x8xf32> to vector<8xf32>
    %71 = vector.shape_cast %70 : vector<8xf32> to vector<8x1xf32>
    %72 = tpu.reciprocal %71 {approx = true} : vector<8x1xf32> -> vector<8x1xf32>
    %73 = vector.broadcast %72 : vector<8x1xf32> to vector<8x8xf32>
    %74 = arith.mulf %69, %73 : vector<8x8xf32>
    %cst_34 = arith.constant dense<0.000000e+00> : vector<8x8xf32>
    %75 = tpu.matmul %74, %58, %cst_34 {dimension_numbers = #tpu.dot_dimension_numbers<[1], [0], [0], [1], [0, 0, 1, 1], [], []>} : vector<8x8xf32>, vector<8x8xf32>, vector<8x8xf32> -> vector<8x8xf32>
    %76 = vector.extract_strided_slice %8 {offsets = [0, 24], sizes = [8, 8], strides = [1, 1]} : vector<8x32xf32> to vector<8x8xf32>
    %77 = vector.extract_strided_slice %14 {offsets = [0, 24], sizes = [8, 8], strides = [1, 1]} : vector<8x32xf32> to vector<8x8xf32>
    %78 = vector.extract_strided_slice %15 {offsets = [0, 24], sizes = [8, 8], strides = [1, 1]} : vector<8x32xf32> to vector<8x8xf32>
    %79 = tpu.transpose %77, [1, 0] : vector<8x8xf32> -> vector<8x8xf32>
    %cst_35 = arith.constant dense<0.000000e+00> : vector<8x8xf32>
    %80 = tpu.matmul %76, %79, %cst_35 {dimension_numbers = #tpu.dot_dimension_numbers<[1], [0], [0], [1], [0, 0, 1, 1], [], []>} : vector<8x8xf32>, vector<8x8xf32>, vector<8x8xf32> -> vector<8x8xf32>
    %cst_36 = arith.constant 0.353553385 : f32
    %81 = vector.broadcast %cst_36 : f32 to vector<8x8xf32>
    %82 = arith.mulf %80, %81 : vector<8x8xf32>
    %c0_37 = arith.constant 0 : index
    %c0_38 = arith.constant 0 : index
    %83 = vector.load %arg11[%c0_37, %c0_38] : memref<8x8xf32, #tpu.memory_space<vmem>>, vector<8x8xf32>
    %84 = arith.addf %82, %83 : vector<8x8xf32>
    %cst_39 = arith.constant dense<0xFF800000> : vector<8xf32>
    %85 = vector.multi_reduction <maximumf>, %84, %cst_39 [1] : vector<8x8xf32> to vector<8xf32>
    %86 = vector.shape_cast %85 : vector<8xf32> to vector<8x1xf32>
    %87 = vector.broadcast %86 : vector<8x1xf32> to vector<8x8xf32>
    %88 = arith.subf %84, %87 : vector<8x8xf32>
    %89 = math.exp %88 : vector<8x8xf32>
    %cst_40 = arith.constant dense<0.000000e+00> : vector<8xf32>
    %90 = vector.multi_reduction <add>, %89, %cst_40 [1] : vector<8x8xf32> to vector<8xf32>
    %91 = vector.shape_cast %90 : vector<8xf32> to vector<8x1xf32>
    %92 = tpu.reciprocal %91 {approx = true} : vector<8x1xf32> -> vector<8x1xf32>
    %93 = vector.broadcast %92 : vector<8x1xf32> to vector<8x8xf32>
    %94 = arith.mulf %89, %93 : vector<8x8xf32>
    %cst_41 = arith.constant dense<0.000000e+00> : vector<8x8xf32>
    %95 = tpu.matmul %94, %78, %cst_41 {dimension_numbers = #tpu.dot_dimension_numbers<[1], [0], [0], [1], [0, 0, 1, 1], [], []>} : vector<8x8xf32>, vector<8x8xf32>, vector<8x8xf32> -> vector<8x8xf32>
    %96 = tpu.concatenate %35, %55, %75, %95 in 1 : vector<8x8xf32>, vector<8x8xf32>, vector<8x8xf32>, vector<8x8xf32> -> vector<8x32xf32>
    %c0_42 = arith.constant 0 : index
    %c0_43 = arith.constant 0 : index
    %97 = vector.load %arg7[%c0_42, %c0_43] : memref<32x32xf32, #tpu.memory_space<vmem>>, vector<32x32xf32>
    %cst_44 = arith.constant dense<0.000000e+00> : vector<8x32xf32>
    %98 = tpu.matmul %96, %97, %cst_44 {dimension_numbers = #tpu.dot_dimension_numbers<[1], [0], [0], [1], [0, 0, 1, 1], [], []>} : vector<8x32xf32>, vector<32x32xf32>, vector<8x32xf32> -> vector<8x32xf32>
    %c0_45 = arith.constant 0 : index
    %c0_46 = arith.constant 0 : index
    %99 = vector.load %arg8[%c0_45, %c0_46] : memref<1x32xf32, #tpu.memory_space<vmem>>, vector<1x32xf32>
    %100 = vector.broadcast %99 : vector<1x32xf32> to vector<8x32xf32>
    %101 = arith.addf %98, %100 : vector<8x32xf32>
    %102 = arith.addf %1, %101 : vector<8x32xf32>
    %cst_47 = arith.constant dense<0.000000e+00> : vector<8xf32>
    %103 = vector.multi_reduction <add>, %102, %cst_47 [1] : vector<8x32xf32> to vector<8xf32>
    %104 = vector.shape_cast %103 : vector<8xf32> to vector<8x1xf32>
    %cst_48 = arith.constant 3.200000e+01 : f32
    %105 = vector.broadcast %cst_48 : f32 to vector<8x1xf32>
    %106 = arith.divf %104, %105 : vector<8x1xf32>
    %107 = vector.broadcast %106 : vector<8x1xf32> to vector<8x32xf32>
    %108 = arith.subf %102, %107 : vector<8x32xf32>
    %109 = arith.mulf %108, %108 : vector<8x32xf32>
    %cst_49 = arith.constant dense<0.000000e+00> : vector<8xf32>
    %110 = vector.multi_reduction <add>, %109, %cst_49 [1] : vector<8x32xf32> to vector<8xf32>
    %111 = vector.shape_cast %110 : vector<8xf32> to vector<8x1xf32>
    %cst_50 = arith.constant 3.200000e+01 : f32
    %112 = vector.broadcast %cst_50 : f32 to vector<8x1xf32>
    %113 = arith.divf %111, %112 : vector<8x1xf32>
    %114 = vector.broadcast %106 : vector<8x1xf32> to vector<8x32xf32>
    %115 = arith.subf %102, %114 : vector<8x32xf32>
    %cst_51 = arith.constant 9.99999974E-6 : f32
    %116 = vector.broadcast %cst_51 : f32 to vector<8x1xf32>
    %117 = arith.addf %113, %116 : vector<8x1xf32>
    %118 = math.rsqrt %117 : vector<8x1xf32>
    %119 = vector.broadcast %118 : vector<8x1xf32> to vector<8x32xf32>
    %120 = arith.mulf %115, %119 : vector<8x32xf32>
    %c0_52 = arith.constant 0 : index
    %c0_53 = arith.constant 0 : index
    %121 = vector.load %arg9[%c0_52, %c0_53] : memref<1x32xf32, #tpu.memory_space<vmem>>, vector<1x32xf32>
    %122 = vector.broadcast %121 : vector<1x32xf32> to vector<8x32xf32>
    %123 = arith.mulf %120, %122 : vector<8x32xf32>
    %c0_54 = arith.constant 0 : index
    %c0_55 = arith.constant 0 : index
    %124 = vector.load %arg10[%c0_54, %c0_55] : memref<1x32xf32, #tpu.memory_space<vmem>>, vector<1x32xf32>
    %125 = vector.broadcast %124 : vector<1x32xf32> to vector<8x32xf32>
    %126 = arith.addf %123, %125 : vector<8x32xf32>
    %c0_56 = arith.constant 0 : index
    %c0_57 = arith.constant 0 : index
    %c0_58 = arith.constant 0 : index
    %127 = vector.load %arg12[%c0_56, %c0_57, %c0_58] : memref<1x8x32xf32, #tpu.memory_space<vmem>>, vector<1x8x32xf32>
    %128 = vector.shape_cast %127 : vector<1x8x32xf32> to vector<8x32xf32>
    %129 = vector.shape_cast %126 : vector<8x32xf32> to vector<1x8x32xf32>
    tpu.vector_store %arg12[%c0_56, %c0_57, %c0_58], %129 {strides = array<i32>} : memref<1x8x32xf32, #tpu.memory_space<vmem>>, vector<1x8x32xf32>,
    return
  }
  func.func @transform_0(%arg0: i32) -> (i32, i32, i32) {
    %c0_i32 = arith.constant 0 : i32
    %c0_i32_0 = arith.constant 0 : i32
    %c0_i32_1 = arith.constant 0 : i32
    return %arg0, %c0_i32, %c0_i32_0 : i32, i32, i32
  }
  func.func @transform_1(%arg0: i32) -> (i32, i32, i32) {
    %c0_i32 = arith.constant 0 : i32
    %c0_i32_0 = arith.constant 0 : i32
    %c0_i32_1 = arith.constant 0 : i32
    return %arg0, %c0_i32, %c0_i32_0 : i32, i32, i32
  }
  func.func @transform_2(%arg0: i32) -> (i32, i32) {
    %c0_i32 = arith.constant 0 : i32
    %c0_i32_0 = arith.constant 0 : i32
    %c0_i32_1 = arith.constant 0 : i32
    return %c0_i32, %c0_i32_0 : i32, i32
  }
  func.func @transform_3(%arg0: i32) -> (i32, i32) {
    %c0_i32 = arith.constant 0 : i32
    %c0_i32_0 = arith.constant 0 : i32
    %c0_i32_1 = arith.constant 0 : i32
    return %c0_i32, %c0_i32_0 : i32, i32
  }
  func.func @transform_4(%arg0: i32) -> (i32, i32) {
    %c0_i32 = arith.constant 0 : i32
    %c0_i32_0 = arith.constant 0 : i32
    %c0_i32_1 = arith.constant 0 : i32
    return %c0_i32, %c0_i32_0 : i32, i32
  }
  func.func @transform_5(%arg0: i32) -> (i32, i32) {
    %c0_i32 = arith.constant 0 : i32
    %c0_i32_0 = arith.constant 0 : i32
    %c0_i32_1 = arith.constant 0 : i32
    return %c0_i32, %c0_i32_0 : i32, i32
  }
  func.func @transform_6(%arg0: i32) -> (i32, i32) {
    %c0_i32 = arith.constant 0 : i32
    %c0_i32_0 = arith.constant 0 : i32
    %c0_i32_1 = arith.constant 0 : i32
    return %c0_i32, %c0_i32_0 : i32, i32
  }
  func.func @transform_7(%arg0: i32) -> (i32, i32) {
    %c0_i32 = arith.constant 0 : i32
    %c0_i32_0 = arith.constant 0 : i32
    %c0_i32_1 = arith.constant 0 : i32
    return %c0_i32, %c0_i32_0 : i32, i32
  }
  func.func @transform_8(%arg0: i32) -> (i32, i32) {
    %c0_i32 = arith.constant 0 : i32
    %c0_i32_0 = arith.constant 0 : i32
    %c0_i32_1 = arith.constant 0 : i32
    return %c0_i32, %c0_i32_0 : i32, i32
  }
  func.func @transform_9(%arg0: i32) -> (i32, i32) {
    %c0_i32 = arith.constant 0 : i32
    %c0_i32_0 = arith.constant 0 : i32
    %c0_i32_1 = arith.constant 0 : i32
    return %c0_i32, %c0_i32_0 : i32, i32
  }
  func.func @transform_10(%arg0: i32) -> (i32, i32) {
    %c0_i32 = arith.constant 0 : i32
    %c0_i32_0 = arith.constant 0 : i32
    %c0_i32_1 = arith.constant 0 : i32
    return %c0_i32, %c0_i32_0 : i32, i32
  }
  func.func @transform_11(%arg0: i32) -> (i32, i32, i32) {
    %c0_i32 = arith.constant 0 : i32
    %c0_i32_0 = arith.constant 0 : i32
    %c0_i32_1 = arith.constant 0 : i32
    return %arg0, %c0_i32, %c0_i32_0 : i32, i32, i32
  }
}

module attributes {stable_mosaic.version = 11 : i64} {
  func.func @_ffn_sublayer_kernel(%arg0: i32, %arg1: memref<16x32xf32, #tpu.memory_space<vmem>>, %arg2: memref<32x64xf32, #tpu.memory_space<vmem>>, %arg3: memref<1x64xf32, #tpu.memory_space<vmem>>, %arg4: memref<64x32xf32, #tpu.memory_space<vmem>>, %arg5: memref<1x32xf32, #tpu.memory_space<vmem>>, %arg6: memref<1x32xf32, #tpu.memory_space<vmem>>, %arg7: memref<1x32xf32, #tpu.memory_space<vmem>>, %arg8: memref<16x32xf32, #tpu.memory_space<vmem>>) attributes {dimension_semantics = [#tpu.dimension_semantics<parallel>], iteration_bounds = array<i64: 1>, scalar_prefetch = 0 : i64, scratch_operands = 0 : i64, tpu.core_type = #tpu.core_type<tc>, window_params = [{transform_indices = @transform_0, window_bounds = array<i64: 16, 32>}, {pipeline_mode = #tpu.pipeline_mode<synchronous>, transform_indices = @transform_1, window_bounds = array<i64: 32, 64>}, {pipeline_mode = #tpu.pipeline_mode<synchronous>, transform_indices = @transform_2, window_bounds = array<i64: 1, 64>}, {pipeline_mode = #tpu.pipeline_mode<synchronous>, transform_indices = @transform_3, window_bounds = array<i64: 64, 32>}, {pipeline_mode = #tpu.pipeline_mode<synchronous>, transform_indices = @transform_4, window_bounds = array<i64: 1, 32>}, {pipeline_mode = #tpu.pipeline_mode<synchronous>, transform_indices = @transform_5, window_bounds = array<i64: 1, 32>}, {pipeline_mode = #tpu.pipeline_mode<synchronous>, transform_indices = @transform_6, window_bounds = array<i64: 1, 32>}, {transform_indices = @transform_7, window_bounds = array<i64: 16, 32>}]} {
    %c0 = arith.constant 0 : index
    %c0_0 = arith.constant 0 : index
    %0 = vector.load %arg1[%c0, %c0_0] : memref<16x32xf32, #tpu.memory_space<vmem>>, vector<16x32xf32>
    %c0_1 = arith.constant 0 : index
    %c0_2 = arith.constant 0 : index
    %1 = vector.load %arg2[%c0_1, %c0_2] : memref<32x64xf32, #tpu.memory_space<vmem>>, vector<32x64xf32>
    %cst = arith.constant dense<0.000000e+00> : vector<16x64xf32>
    %2 = tpu.matmul %0, %1, %cst {dimension_numbers = #tpu.dot_dimension_numbers<[1], [0], [0], [1], [0, 0, 1, 1], [], []>} : vector<16x32xf32>, vector<32x64xf32>, vector<16x64xf32> -> vector<16x64xf32>
    %c0_3 = arith.constant 0 : index
    %c0_4 = arith.constant 0 : index
    %3 = vector.load %arg3[%c0_3, %c0_4] : memref<1x64xf32, #tpu.memory_space<vmem>>, vector<1x64xf32>
    %4 = vector.broadcast %3 : vector<1x64xf32> to vector<16x64xf32>
    %5 = arith.addf %2, %4 : vector<16x64xf32>
    %cst_5 = arith.constant 0.000000e+00 : f32
    %6 = vector.broadcast %cst_5 : f32 to vector<16x64xf32>
    %7 = arith.maximumf %5, %6 : vector<16x64xf32>
    %c0_6 = arith.constant 0 : index
    %c0_7 = arith.constant 0 : index
    %8 = vector.load %arg4[%c0_6, %c0_7] : memref<64x32xf32, #tpu.memory_space<vmem>>, vector<64x32xf32>
    %cst_8 = arith.constant dense<0.000000e+00> : vector<16x32xf32>
    %9 = tpu.matmul %7, %8, %cst_8 {dimension_numbers = #tpu.dot_dimension_numbers<[1], [0], [0], [1], [0, 0, 1, 1], [], []>} : vector<16x64xf32>, vector<64x32xf32>, vector<16x32xf32> -> vector<16x32xf32>
    %c0_9 = arith.constant 0 : index
    %c0_10 = arith.constant 0 : index
    %10 = vector.load %arg5[%c0_9, %c0_10] : memref<1x32xf32, #tpu.memory_space<vmem>>, vector<1x32xf32>
    %11 = vector.broadcast %10 : vector<1x32xf32> to vector<16x32xf32>
    %12 = arith.addf %9, %11 : vector<16x32xf32>
    %13 = arith.addf %0, %12 : vector<16x32xf32>
    %cst_11 = arith.constant dense<0.000000e+00> : vector<16xf32>
    %14 = vector.multi_reduction <add>, %13, %cst_11 [1] : vector<16x32xf32> to vector<16xf32>
    %15 = vector.shape_cast %14 : vector<16xf32> to vector<16x1xf32>
    %cst_12 = arith.constant 3.200000e+01 : f32
    %16 = vector.broadcast %cst_12 : f32 to vector<16x1xf32>
    %17 = arith.divf %15, %16 : vector<16x1xf32>
    %18 = vector.broadcast %17 : vector<16x1xf32> to vector<16x32xf32>
    %19 = arith.subf %13, %18 : vector<16x32xf32>
    %20 = arith.mulf %19, %19 : vector<16x32xf32>
    %cst_13 = arith.constant dense<0.000000e+00> : vector<16xf32>
    %21 = vector.multi_reduction <add>, %20, %cst_13 [1] : vector<16x32xf32> to vector<16xf32>
    %22 = vector.shape_cast %21 : vector<16xf32> to vector<16x1xf32>
    %cst_14 = arith.constant 3.200000e+01 : f32
    %23 = vector.broadcast %cst_14 : f32 to vector<16x1xf32>
    %24 = arith.divf %22, %23 : vector<16x1xf32>
    %25 = vector.broadcast %17 : vector<16x1xf32> to vector<16x32xf32>
    %26 = arith.subf %13, %25 : vector<16x32xf32>
    %cst_15 = arith.constant 9.99999974E-6 : f32
    %27 = vector.broadcast %cst_15 : f32 to vector<16x1xf32>
    %28 = arith.addf %24, %27 : vector<16x1xf32>
    %29 = math.rsqrt %28 : vector<16x1xf32>
    %30 = vector.broadcast %29 : vector<16x1xf32> to vector<16x32xf32>
    %31 = arith.mulf %26, %30 : vector<16x32xf32>
    %c0_16 = arith.constant 0 : index
    %c0_17 = arith.constant 0 : index
    %32 = vector.load %arg6[%c0_16, %c0_17] : memref<1x32xf32, #tpu.memory_space<vmem>>, vector<1x32xf32>
    %33 = vector.broadcast %32 : vector<1x32xf32> to vector<16x32xf32>
    %34 = arith.mulf %31, %33 : vector<16x32xf32>
    %c0_18 = arith.constant 0 : index
    %c0_19 = arith.constant 0 : index
    %35 = vector.load %arg7[%c0_18, %c0_19] : memref<1x32xf32, #tpu.memory_space<vmem>>, vector<1x32xf32>
    %36 = vector.broadcast %35 : vector<1x32xf32> to vector<16x32xf32>
    %37 = arith.addf %34, %36 : vector<16x32xf32>
    %c0_20 = arith.constant 0 : index
    %c0_21 = arith.constant 0 : index
    %38 = vector.load %arg8[%c0_20, %c0_21] : memref<16x32xf32, #tpu.memory_space<vmem>>, vector<16x32xf32>
    tpu.vector_store %arg8[%c0_20, %c0_21], %37 {strides = array<i32>} : memref<16x32xf32, #tpu.memory_space<vmem>>, vector<16x32xf32>,
    return
  }
  func.func @transform_0(%arg0: i32) -> (i32, i32) {
    %c0_i32 = arith.constant 0 : i32
    %c0_i32_0 = arith.constant 0 : i32
    return %arg0, %c0_i32 : i32, i32
  }
  func.func @transform_1(%arg0: i32) -> (i32, i32) {
    %c0_i32 = arith.constant 0 : i32
    %c0_i32_0 = arith.constant 0 : i32
    %c0_i32_1 = arith.constant 0 : i32
    return %c0_i32, %c0_i32_0 : i32, i32
  }
  func.func @transform_2(%arg0: i32) -> (i32, i32) {
    %c0_i32 = arith.constant 0 : i32
    %c0_i32_0 = arith.constant 0 : i32
    %c0_i32_1 = arith.constant 0 : i32
    return %c0_i32, %c0_i32_0 : i32, i32
  }
  func.func @transform_3(%arg0: i32) -> (i32, i32) {
    %c0_i32 = arith.constant 0 : i32
    %c0_i32_0 = arith.constant 0 : i32
    %c0_i32_1 = arith.constant 0 : i32
    return %c0_i32, %c0_i32_0 : i32, i32
  }
  func.func @transform_4(%arg0: i32) -> (i32, i32) {
    %c0_i32 = arith.constant 0 : i32
    %c0_i32_0 = arith.constant 0 : i32
    %c0_i32_1 = arith.constant 0 : i32
    return %c0_i32, %c0_i32_0 : i32, i32
  }
  func.func @transform_5(%arg0: i32) -> (i32, i32) {
    %c0_i32 = arith.constant 0 : i32
    %c0_i32_0 = arith.constant 0 : i32
    %c0_i32_1 = arith.constant 0 : i32
    return %c0_i32, %c0_i32_0 : i32, i32
  }
  func.func @transform_6(%arg0: i32) -> (i32, i32) {
    %c0_i32 = arith.constant 0 : i32
    %c0_i32_0 = arith.constant 0 : i32
    %c0_i32_1 = arith.constant 0 : i32
    return %c0_i32, %c0_i32_0 : i32, i32
  }
  func.func @transform_7(%arg0: i32) -> (i32, i32) {
    %c0_i32 = arith.constant 0 : i32
    %c0_i32_0 = arith.constant 0 : i32
    return %arg0, %c0_i32 : i32, i32
  }
}

module attributes {stable_mosaic.version = 11 : i64} {
  func.func @_ffn_sublayer_kernel(%arg0: i32, %arg1: memref<16x32xf32, #tpu.memory_space<vmem>>, %arg2: memref<32x64xf32, #tpu.memory_space<vmem>>, %arg3: memref<1x64xf32, #tpu.memory_space<vmem>>, %arg4: memref<64x32xf32, #tpu.memory_space<vmem>>, %arg5: memref<1x32xf32, #tpu.memory_space<vmem>>, %arg6: memref<1x32xf32, #tpu.memory_space<vmem>>, %arg7: memref<1x32xf32, #tpu.memory_space<vmem>>, %arg8: memref<16x32xf32, #tpu.memory_space<vmem>>) attributes {dimension_semantics = [#tpu.dimension_semantics<parallel>], iteration_bounds = array<i64: 1>, scalar_prefetch = 0 : i64, scratch_operands = 0 : i64, tpu.core_type = #tpu.core_type<tc>, window_params = [{transform_indices = @transform_0, window_bounds = array<i64: 16, 32>}, {pipeline_mode = #tpu.pipeline_mode<synchronous>, transform_indices = @transform_1, window_bounds = array<i64: 32, 64>}, {pipeline_mode = #tpu.pipeline_mode<synchronous>, transform_indices = @transform_2, window_bounds = array<i64: 1, 64>}, {pipeline_mode = #tpu.pipeline_mode<synchronous>, transform_indices = @transform_3, window_bounds = array<i64: 64, 32>}, {pipeline_mode = #tpu.pipeline_mode<synchronous>, transform_indices = @transform_4, window_bounds = array<i64: 1, 32>}, {pipeline_mode = #tpu.pipeline_mode<synchronous>, transform_indices = @transform_5, window_bounds = array<i64: 1, 32>}, {pipeline_mode = #tpu.pipeline_mode<synchronous>, transform_indices = @transform_6, window_bounds = array<i64: 1, 32>}, {transform_indices = @transform_7, window_bounds = array<i64: 16, 32>}]} {
    %c0 = arith.constant 0 : index
    %c0_0 = arith.constant 0 : index
    %0 = vector.load %arg1[%c0, %c0_0] : memref<16x32xf32, #tpu.memory_space<vmem>>, vector<16x32xf32>
    %c0_1 = arith.constant 0 : index
    %c0_2 = arith.constant 0 : index
    %1 = vector.load %arg2[%c0_1, %c0_2] : memref<32x64xf32, #tpu.memory_space<vmem>>, vector<32x64xf32>
    %cst = arith.constant dense<0.000000e+00> : vector<16x64xf32>
    %2 = tpu.matmul %0, %1, %cst {dimension_numbers = #tpu.dot_dimension_numbers<[1], [0], [0], [1], [0, 0, 1, 1], [], []>} : vector<16x32xf32>, vector<32x64xf32>, vector<16x64xf32> -> vector<16x64xf32>
    %c0_3 = arith.constant 0 : index
    %c0_4 = arith.constant 0 : index
    %3 = vector.load %arg3[%c0_3, %c0_4] : memref<1x64xf32, #tpu.memory_space<vmem>>, vector<1x64xf32>
    %4 = vector.broadcast %3 : vector<1x64xf32> to vector<16x64xf32>
    %5 = arith.addf %2, %4 : vector<16x64xf32>
    %cst_5 = arith.constant 0.000000e+00 : f32
    %6 = vector.broadcast %cst_5 : f32 to vector<16x64xf32>
    %7 = arith.maximumf %5, %6 : vector<16x64xf32>
    %c0_6 = arith.constant 0 : index
    %c0_7 = arith.constant 0 : index
    %8 = vector.load %arg4[%c0_6, %c0_7] : memref<64x32xf32, #tpu.memory_space<vmem>>, vector<64x32xf32>
    %cst_8 = arith.constant dense<0.000000e+00> : vector<16x32xf32>
    %9 = tpu.matmul %7, %8, %cst_8 {dimension_numbers = #tpu.dot_dimension_numbers<[1], [0], [0], [1], [0, 0, 1, 1], [], []>} : vector<16x64xf32>, vector<64x32xf32>, vector<16x32xf32> -> vector<16x32xf32>
    %c0_9 = arith.constant 0 : index
    %c0_10 = arith.constant 0 : index
    %10 = vector.load %arg5[%c0_9, %c0_10] : memref<1x32xf32, #tpu.memory_space<vmem>>, vector<1x32xf32>
    %11 = vector.broadcast %10 : vector<1x32xf32> to vector<16x32xf32>
    %12 = arith.addf %9, %11 : vector<16x32xf32>
    %13 = arith.addf %0, %12 : vector<16x32xf32>
    %cst_11 = arith.constant dense<0.000000e+00> : vector<16xf32>
    %14 = vector.multi_reduction <add>, %13, %cst_11 [1] : vector<16x32xf32> to vector<16xf32>
    %15 = vector.shape_cast %14 : vector<16xf32> to vector<16x1xf32>
    %cst_12 = arith.constant 3.200000e+01 : f32
    %16 = vector.broadcast %cst_12 : f32 to vector<16x1xf32>
    %17 = arith.divf %15, %16 : vector<16x1xf32>
    %18 = vector.broadcast %17 : vector<16x1xf32> to vector<16x32xf32>
    %19 = arith.subf %13, %18 : vector<16x32xf32>
    %20 = arith.mulf %19, %19 : vector<16x32xf32>
    %cst_13 = arith.constant dense<0.000000e+00> : vector<16xf32>
    %21 = vector.multi_reduction <add>, %20, %cst_13 [1] : vector<16x32xf32> to vector<16xf32>
    %22 = vector.shape_cast %21 : vector<16xf32> to vector<16x1xf32>
    %cst_14 = arith.constant 3.200000e+01 : f32
    %23 = vector.broadcast %cst_14 : f32 to vector<16x1xf32>
    %24 = arith.divf %22, %23 : vector<16x1xf32>
    %25 = vector.broadcast %17 : vector<16x1xf32> to vector<16x32xf32>
    %26 = arith.subf %13, %25 : vector<16x32xf32>
    %cst_15 = arith.constant 9.99999974E-6 : f32
    %27 = vector.broadcast %cst_15 : f32 to vector<16x1xf32>
    %28 = arith.addf %24, %27 : vector<16x1xf32>
    %29 = math.rsqrt %28 : vector<16x1xf32>
    %30 = vector.broadcast %29 : vector<16x1xf32> to vector<16x32xf32>
    %31 = arith.mulf %26, %30 : vector<16x32xf32>
    %c0_16 = arith.constant 0 : index
    %c0_17 = arith.constant 0 : index
    %32 = vector.load %arg6[%c0_16, %c0_17] : memref<1x32xf32, #tpu.memory_space<vmem>>, vector<1x32xf32>
    %33 = vector.broadcast %32 : vector<1x32xf32> to vector<16x32xf32>
    %34 = arith.mulf %31, %33 : vector<16x32xf32>
    %c0_18 = arith.constant 0 : index
    %c0_19 = arith.constant 0 : index
    %35 = vector.load %arg7[%c0_18, %c0_19] : memref<1x32xf32, #tpu.memory_space<vmem>>, vector<1x32xf32>
    %36 = vector.broadcast %35 : vector<1x32xf32> to vector<16x32xf32>
    %37 = arith.addf %34, %36 : vector<16x32xf32>
    %c0_20 = arith.constant 0 : index
    %c0_21 = arith.constant 0 : index
    %38 = vector.load %arg8[%c0_20, %c0_21] : memref<16x32xf32, #tpu.memory_space<vmem>>, vector<16x32xf32>
    tpu.vector_store %arg8[%c0_20, %c0_21], %37 {strides = array<i32>} : memref<16x32xf32, #tpu.memory_space<vmem>>, vector<16x32xf32>,
    return
  }
  func.func @transform_0(%arg0: i32) -> (i32, i32) {
    %c0_i32 = arith.constant 0 : i32
    %c0_i32_0 = arith.constant 0 : i32
    return %arg0, %c0_i32 : i32, i32
  }
  func.func @transform_1(%arg0: i32) -> (i32, i32) {
    %c0_i32 = arith.constant 0 : i32
    %c0_i32_0 = arith.constant 0 : i32
    %c0_i32_1 = arith.constant 0 : i32
    return %c0_i32, %c0_i32_0 : i32, i32
  }
  func.func @transform_2(%arg0: i32) -> (i32, i32) {
    %c0_i32 = arith.constant 0 : i32
    %c0_i32_0 = arith.constant 0 : i32
    %c0_i32_1 = arith.constant 0 : i32
    return %c0_i32, %c0_i32_0 : i32, i32
  }
  func.func @transform_3(%arg0: i32) -> (i32, i32) {
    %c0_i32 = arith.constant 0 : i32
    %c0_i32_0 = arith.constant 0 : i32
    %c0_i32_1 = arith.constant 0 : i32
    return %c0_i32, %c0_i32_0 : i32, i32
  }
  func.func @transform_4(%arg0: i32) -> (i32, i32) {
    %c0_i32 = arith.constant 0 : i32
    %c0_i32_0 = arith.constant 0 : i32
    %c0_i32_1 = arith.constant 0 : i32
    return %c0_i32, %c0_i32_0 : i32, i32
  }
  func.func @transform_5(%arg0: i32) -> (i32, i32) {
    %c0_i32 = arith.constant 0 : i32
    %c0_i32_0 = arith.constant 0 : i32
    %c0_i32_1 = arith.constant 0 : i32
    return %c0_i32, %c0_i32_0 : i32, i32
  }
  func.func @transform_6(%arg0: i32) -> (i32, i32) {
    %c0_i32 = arith.constant 0 : i32
    %c0_i32_0 = arith.constant 0 : i32
    %c0_i32_1 = arith.constant 0 : i32
    return %c0_i32, %c0_i32_0 : i32, i32
  }
  func.func @transform_7(%arg0: i32) -> (i32, i32) {
    %c0_i32 = arith.constant 0 : i32
    %c0_i32_0 = arith.constant 0 : i32
    return %arg0, %c0_i32 : i32, i32
  }
}

module attributes {stable_mosaic.version = 11 : i64} {
  func.func @_ffn_sublayer_kernel(%arg0: i32, %arg1: memref<16x32xf32, #tpu.memory_space<vmem>>, %arg2: memref<32x64xf32, #tpu.memory_space<vmem>>, %arg3: memref<1x64xf32, #tpu.memory_space<vmem>>, %arg4: memref<64x32xf32, #tpu.memory_space<vmem>>, %arg5: memref<1x32xf32, #tpu.memory_space<vmem>>, %arg6: memref<1x32xf32, #tpu.memory_space<vmem>>, %arg7: memref<1x32xf32, #tpu.memory_space<vmem>>, %arg8: memref<16x32xf32, #tpu.memory_space<vmem>>) attributes {dimension_semantics = [#tpu.dimension_semantics<parallel>], iteration_bounds = array<i64: 1>, scalar_prefetch = 0 : i64, scratch_operands = 0 : i64, tpu.core_type = #tpu.core_type<tc>, window_params = [{transform_indices = @transform_0, window_bounds = array<i64: 16, 32>}, {pipeline_mode = #tpu.pipeline_mode<synchronous>, transform_indices = @transform_1, window_bounds = array<i64: 32, 64>}, {pipeline_mode = #tpu.pipeline_mode<synchronous>, transform_indices = @transform_2, window_bounds = array<i64: 1, 64>}, {pipeline_mode = #tpu.pipeline_mode<synchronous>, transform_indices = @transform_3, window_bounds = array<i64: 64, 32>}, {pipeline_mode = #tpu.pipeline_mode<synchronous>, transform_indices = @transform_4, window_bounds = array<i64: 1, 32>}, {pipeline_mode = #tpu.pipeline_mode<synchronous>, transform_indices = @transform_5, window_bounds = array<i64: 1, 32>}, {pipeline_mode = #tpu.pipeline_mode<synchronous>, transform_indices = @transform_6, window_bounds = array<i64: 1, 32>}, {transform_indices = @transform_7, window_bounds = array<i64: 16, 32>}]} {
    %c0 = arith.constant 0 : index
    %c0_0 = arith.constant 0 : index
    %0 = vector.load %arg1[%c0, %c0_0] : memref<16x32xf32, #tpu.memory_space<vmem>>, vector<16x32xf32>
    %c0_1 = arith.constant 0 : index
    %c0_2 = arith.constant 0 : index
    %1 = vector.load %arg2[%c0_1, %c0_2] : memref<32x64xf32, #tpu.memory_space<vmem>>, vector<32x64xf32>
    %cst = arith.constant dense<0.000000e+00> : vector<16x64xf32>
    %2 = tpu.matmul %0, %1, %cst {dimension_numbers = #tpu.dot_dimension_numbers<[1], [0], [0], [1], [0, 0, 1, 1], [], []>} : vector<16x32xf32>, vector<32x64xf32>, vector<16x64xf32> -> vector<16x64xf32>
    %c0_3 = arith.constant 0 : index
    %c0_4 = arith.constant 0 : index
    %3 = vector.load %arg3[%c0_3, %c0_4] : memref<1x64xf32, #tpu.memory_space<vmem>>, vector<1x64xf32>
    %4 = vector.broadcast %3 : vector<1x64xf32> to vector<16x64xf32>
    %5 = arith.addf %2, %4 : vector<16x64xf32>
    %cst_5 = arith.constant 0.000000e+00 : f32
    %6 = vector.broadcast %cst_5 : f32 to vector<16x64xf32>
    %7 = arith.maximumf %5, %6 : vector<16x64xf32>
    %c0_6 = arith.constant 0 : index
    %c0_7 = arith.constant 0 : index
    %8 = vector.load %arg4[%c0_6, %c0_7] : memref<64x32xf32, #tpu.memory_space<vmem>>, vector<64x32xf32>
    %cst_8 = arith.constant dense<0.000000e+00> : vector<16x32xf32>
    %9 = tpu.matmul %7, %8, %cst_8 {dimension_numbers = #tpu.dot_dimension_numbers<[1], [0], [0], [1], [0, 0, 1, 1], [], []>} : vector<16x64xf32>, vector<64x32xf32>, vector<16x32xf32> -> vector<16x32xf32>
    %c0_9 = arith.constant 0 : index
    %c0_10 = arith.constant 0 : index
    %10 = vector.load %arg5[%c0_9, %c0_10] : memref<1x32xf32, #tpu.memory_space<vmem>>, vector<1x32xf32>
    %11 = vector.broadcast %10 : vector<1x32xf32> to vector<16x32xf32>
    %12 = arith.addf %9, %11 : vector<16x32xf32>
    %13 = arith.addf %0, %12 : vector<16x32xf32>
    %cst_11 = arith.constant dense<0.000000e+00> : vector<16xf32>
    %14 = vector.multi_reduction <add>, %13, %cst_11 [1] : vector<16x32xf32> to vector<16xf32>
    %15 = vector.shape_cast %14 : vector<16xf32> to vector<16x1xf32>
    %cst_12 = arith.constant 3.200000e+01 : f32
    %16 = vector.broadcast %cst_12 : f32 to vector<16x1xf32>
    %17 = arith.divf %15, %16 : vector<16x1xf32>
    %18 = vector.broadcast %17 : vector<16x1xf32> to vector<16x32xf32>
    %19 = arith.subf %13, %18 : vector<16x32xf32>
    %20 = arith.mulf %19, %19 : vector<16x32xf32>
    %cst_13 = arith.constant dense<0.000000e+00> : vector<16xf32>
    %21 = vector.multi_reduction <add>, %20, %cst_13 [1] : vector<16x32xf32> to vector<16xf32>
    %22 = vector.shape_cast %21 : vector<16xf32> to vector<16x1xf32>
    %cst_14 = arith.constant 3.200000e+01 : f32
    %23 = vector.broadcast %cst_14 : f32 to vector<16x1xf32>
    %24 = arith.divf %22, %23 : vector<16x1xf32>
    %25 = vector.broadcast %17 : vector<16x1xf32> to vector<16x32xf32>
    %26 = arith.subf %13, %25 : vector<16x32xf32>
    %cst_15 = arith.constant 9.99999974E-6 : f32
    %27 = vector.broadcast %cst_15 : f32 to vector<16x1xf32>
    %28 = arith.addf %24, %27 : vector<16x1xf32>
    %29 = math.rsqrt %28 : vector<16x1xf32>
    %30 = vector.broadcast %29 : vector<16x1xf32> to vector<16x32xf32>
    %31 = arith.mulf %26, %30 : vector<16x32xf32>
    %c0_16 = arith.constant 0 : index
    %c0_17 = arith.constant 0 : index
    %32 = vector.load %arg6[%c0_16, %c0_17] : memref<1x32xf32, #tpu.memory_space<vmem>>, vector<1x32xf32>
    %33 = vector.broadcast %32 : vector<1x32xf32> to vector<16x32xf32>
    %34 = arith.mulf %31, %33 : vector<16x32xf32>
    %c0_18 = arith.constant 0 : index
    %c0_19 = arith.constant 0 : index
    %35 = vector.load %arg7[%c0_18, %c0_19] : memref<1x32xf32, #tpu.memory_space<vmem>>, vector<1x32xf32>
    %36 = vector.broadcast %35 : vector<1x32xf32> to vector<16x32xf32>
    %37 = arith.addf %34, %36 : vector<16x32xf32>
    %c0_20 = arith.constant 0 : index
    %c0_21 = arith.constant 0 : index
    %38 = vector.load %arg8[%c0_20, %c0_21] : memref<16x32xf32, #tpu.memory_space<vmem>>, vector<16x32xf32>
    tpu.vector_store %arg8[%c0_20, %c0_21], %37 {strides = array<i32>} : memref<16x32xf32, #tpu.memory_space<vmem>>, vector<16x32xf32>,
    return
  }
  func.func @transform_0(%arg0: i32) -> (i32, i32) {
    %c0_i32 = arith.constant 0 : i32
    %c0_i32_0 = arith.constant 0 : i32
    return %arg0, %c0_i32 : i32, i32
  }
  func.func @transform_1(%arg0: i32) -> (i32, i32) {
    %c0_i32 = arith.constant 0 : i32
    %c0_i32_0 = arith.constant 0 : i32
    %c0_i32_1 = arith.constant 0 : i32
    return %c0_i32, %c0_i32_0 : i32, i32
  }
  func.func @transform_2(%arg0: i32) -> (i32, i32) {
    %c0_i32 = arith.constant 0 : i32
    %c0_i32_0 = arith.constant 0 : i32
    %c0_i32_1 = arith.constant 0 : i32
    return %c0_i32, %c0_i32_0 : i32, i32
  }
  func.func @transform_3(%arg0: i32) -> (i32, i32) {
    %c0_i32 = arith.constant 0 : i32
    %c0_i32_0 = arith.constant 0 : i32
    %c0_i32_1 = arith.constant 0 : i32
    return %c0_i32, %c0_i32_0 : i32, i32
  }
  func.func @transform_4(%arg0: i32) -> (i32, i32) {
    %c0_i32 = arith.constant 0 : i32
    %c0_i32_0 = arith.constant 0 : i32
    %c0_i32_1 = arith.constant 0 : i32
    return %c0_i32, %c0_i32_0 : i32, i32
  }
  func.func @transform_5(%arg0: i32) -> (i32, i32) {
    %c0_i32 = arith.constant 0 : i32
    %c0_i32_0 = arith.constant 0 : i32
    %c0_i32_1 = arith.constant 0 : i32
    return %c0_i32, %c0_i32_0 : i32, i32
  }
  func.func @transform_6(%arg0: i32) -> (i32, i32) {
    %c0_i32 = arith.constant 0 : i32
    %c0_i32_0 = arith.constant 0 : i32
    %c0_i32_1 = arith.constant 0 : i32
    return %c0_i32, %c0_i32_0 : i32, i32
  }
  func.func @transform_7(%arg0: i32) -> (i32, i32) {
    %c0_i32 = arith.constant 0 : i32
    %c0_i32_0 = arith.constant 0 : i32
    return %arg0, %c0_i32 : i32, i32
  }
}

</mosaic_0001>

<bundles_post_ra>
// kernel: transformer_forward.16
= control target key start
LH: loop header
LB: loop body
LE: loop exit
PB: predicated region body
PF: predicated region fallthrough
CT: control target
= control target key end

     0   :  { %12 = vsyncpa [#allocation3], 0  ;;  %s442_s0 = inlined_call_operand.vmem [shape: f32[16,32], index: 0, kind: input, shape index: {}]   ;;  %s443_s1 = inlined_call_operand.vmem [shape: f32[32,64], index: 1, kind: input, shape index: {}]   ;;  %s444_s2 = inlined_call_operand.vmem [shape: f32[1,64], index: 2, kind: input, shape index: {}]   ;;  %s445_s3 = inlined_call_operand.vmem [shape: f32[64,32], index: 3, kind: input, shape index: {}]   ;;  %s446_s4 = inlined_call_operand.hbm [shape: f32[1,32], index: 4, kind: input, shape index: {}]   ;;  %s447_s5 = inlined_call_operand.hbm [shape: f32[1,32], index: 5, kind: input, shape index: {}]   ;;  %s448_s6 = inlined_call_operand.hbm [shape: f32[1,32], index: 6, kind: input, shape index: {}]   ;;  %s449_s7 = inlined_call_operand.vmem [shape: f32[16,32], index: 7, kind: output, shape index: {}]  }
   0x1   :  { %13 = vsyncpa [#allocation5], 0  ;;  %s38_s26 = sshll.u32 %s447_s5, 4  ;;  %s330_s27 = smov [#allocation4]   ;;  %s39_s26 = int_to_ptr.hbm [resolvable:$true] %s38_s26 }
   0x2   :  { %s40_s28 = sshll.u32 %s330_s27, 4  ;;  %s27_s8 = sshll.u32 %s446_s4, 4  ;;  %s41_s28 = int_to_ptr.vmem [resolvable:$true] %s40_s28  ;;  %s28_s8 = int_to_ptr.hbm [resolvable:$true] %s27_s8 }
   0x3   :  { %43 = dma.hbm_to_vmem [thread:$0]  %s39_s26, 16, %s41_s28, [#allocation5]  }
   0x4   :  { %s331_s9 = smov [#allocation2]   ;;  %s49_s13 = sshll.u32 %s448_s6, 4  ;;  %s50_s13 = int_to_ptr.hbm [resolvable:$true] %s49_s13 }
   0x5   :  { %s29_s10 = sshll.u32 %s331_s9, 4  ;;  %s332_s5 = smov [#allocation6]   ;;  %s30_s10 = int_to_ptr.vmem [resolvable:$true] %s29_s10 }
   0x6   :  { %32 = dma.hbm_to_vmem [thread:$0]  %s28_s8, 16, %s30_s10, [#allocation3]  }
   0x7   :  { %s51_s14 = sshll.u32 %s332_s5, 4  ;;  %s52_s14 = int_to_ptr.vmem [resolvable:$true] %s51_s14 }
   0x8   :  { %54 = dma.hbm_to_vmem [thread:$0]  %s50_s13, 16, %s52_s14, [#allocation5]  }
   0x9   :  { %326 = dma.done.wait [#allocation3], 16  }
   0xa   :  { %327 = vsyncadd [#allocation3], 4294967280 }
   0xb   :  { %328 = dma.done.wait [#allocation5], 32  }
   0xc   :  { %329 = vsyncadd [#allocation5], 4294967264  ;;  %v72_v0 = vld [vmem:[%s443_s1 + $0x18] sm:$0xff]  ;;  %v71_v1 = vld [vmem:[%s443_s1 + $0x10] sm:$0xff]  ;;  %vm77_vm0 = vcmask 261120   ;;  %vm121_vm1 = vcmask 523264  }
   0xd   :  { %96 = vmatpush.msra.mxu0 %v72_v0  ;;  %228 = vmatpush.msra.mxu3 %v72_v0  ;;  %v70_v2 = vld [vmem:[%s443_s1 + $0x8] sm:$0xff]  ;;  %v116_v3 = vld [vmem:[%s445_s3 + $0x38] sm:$0xff]  ;;  %v115_v4 = vld [vmem:[%s445_s3 + $0x30] sm:$0xff]  ;;  %v333_v30 = vmov 32.0  }
   0xe   :  { %v69_v5 = vld [vmem:[%s443_s1] sm:$0xff]  ;;  %136 = vmatpush.msra.mxu1 %v116_v3  ;;  %232 = vmatpush.msra.mxu2 %v116_v3  ;;  %v68_v7 = vld [vmem:[%s442_s0 + $0x8] sm:$0xff]  ;;  %v112_v10 = vld [vmem:[%s445_s3 + $0x18] sm:$0xff]  ;;  %248 = vrcp.f32 %v333_v30 }
   0xf   :  { %97 = vmatpush.msra.mxu0 %v71_v1  ;;  %229 = vmatpush.msra.mxu3 %v71_v1  ;;  %v67_v6 = vld [vmem:[%s442_s0] sm:$0xff]  ;;  %v114_v8 = vld [vmem:[%s445_s3 + $0x28] sm:$0xff]  ;;  %v111_v11 = vld [vmem:[%s445_s3 + $0x10] sm:$0xff] }
  0x10   :  { %137 = vmatpush.msra.mxu1 %v115_v4  ;;  %233 = vmatpush.msra.mxu2 %v115_v4  ;;  %v113_v9 = vld [vmem:[%s445_s3 + $0x20] sm:$0xff]  ;;  %v110_v12 = vld [vmem:[%s445_s3 + $0x8] sm:$0xff] }
  0x11   :  { %98 = vmatpush.msra.mxu0 %v70_v2  ;;  %230 = vmatpush.msra.mxu3 %v70_v2  ;;  %v109_v13 = vld [vmem:[%s445_s3] sm:$0xff] }
  0x12   :  { %138 = vmatpush.msra.mxu1 %v114_v8  ;;  %234 = vmatpush.msra.mxu2 %v114_v8  ;;  %v244_v14 = vld [vmem:[%s444_s2] ss:$0 sm:$0xff]  ;;  %v246_v59 = vld [vmem:[#allocation4] ss:$0 sm:$0xff]  ;;  %v247_v62 = vld [vmem:[#allocation6] ss:$0 sm:$0xff] }
  0x13   :  { %99 = vmatpush.msra.mxu0 %v69_v5  ;;  %231 = vmatpush.msra.mxu3 %v69_v5  ;;  %v245_v21 = vld [vmem:[#allocation2] ss:$0 sm:$0xff] }
  0x14   :  { %224 = vmatmul.msk.f32.vlgmr.msra.gmra.mxu0 %vm77_vm0, %v67_v6  ;;  %225 = vmatmul.msk.f32.vlgmr.msra.gmra.mxu3 %vm77_vm0, %v68_v7  ;;  %v249_v31 = vpop.eup %248 }
  0x15   :  { %139 = vmatpush.msra.mxu1 %v113_v9  ;;  %235 = vmatpush.msra.mxu2 %v113_v9  ;;  %v160_v32 = vmul.f32 32.0, %v249_v31  ;;  %vm164_vm2 = vweird.f32 %v249_v31 }
  0x17   :  { %140 = vmatpush.msra.mxu1 %v112_v10  ;;  %236 = vmatpush.msra.mxu2 %v112_v10  ;;  %v161_v33 = vsub.f32 1.0, %v160_v32 }
  0x19   :  { %141 = vmatpush.msra.mxu1 %v111_v11  ;;  %237 = vmatpush.msra.mxu2 %v111_v11  ;;  %v162_v34 = vmul.f32 %v249_v31, %v161_v33 }
  0x1b   :  { %142 = vmatpush.msra.mxu1 %v110_v12  ;;  %238 = vmatpush.msra.mxu2 %v110_v12  ;;  %v163_v35 = vadd.f32 %v249_v31, %v162_v34 }
  0x1d   :  { %143 = vmatpush.msra.mxu1 %v109_v13  ;;  %239 = vmatpush.msra.mxu2 %v109_v13  ;;  %v165_v36 = vsel %vm164_vm2, %v249_v31, %v163_v35 }
  0x91   :  { %v101_v15 = vpop.f32.mrf.mxu0 }
  0x92   :  { %v102_v16 = vadd.f32 %v244_v14, %v101_v15 }
  0x94   :  { %v107_v17 = vmax.f32 %v102_v16, 0.0 }
  0x96   :  { %226 = vmatmul.msk.f32.vlgmr.msra.gmra.mxu1 %vm121_vm1, %v107_v17 }
  0x97   :  { %v104_v18 = vpop.f32.mrf.mxu3 }
  0x98   :  { %v105_v19 = vadd.f32 %v244_v14, %v104_v18 }
  0x9a   :  { %v108_v20 = vmax.f32 %v105_v19, 0.0 }
  0x9c   :  { %227 = vmatmul.msk.f32.vlgmr.msra.gmra.mxu2 %vm121_vm1, %v108_v20 }
 0x113   :  { %v145_v22 = vpop.f32.mrf.mxu1 }
 0x114   :  { %v146_v23 = vadd.f32 %v245_v21, %v145_v22 }
 0x116   :  { %v151_v24 = vadd.f32 %v146_v23, %v67_v6 }
 0x118   :  { %v153_v25 = vsel %vm77_vm0, %v151_v24, 0.0 }
 0x119   :  { %154 = vadd.xlane.f32.xlu0 %v153_v25 }
 0x11f   :  { %v148_v26 = vpop.f32.mrf.mxu2 }
 0x120   :  { %v149_v27 = vadd.f32 %v245_v21, %v148_v26 }
 0x122   :  { %v152_v28 = vadd.f32 %v149_v27, %v68_v7 }
 0x124   :  { %v156_v29 = vsel %vm77_vm0, %v152_v28, 0.0 }
 0x125   :  { %157 = vadd.xlane.f32.xlu0 %v156_v29 }
 0x18c   :  { %v155_v37 = vpop.xlane.xlu0 %154 }
 0x18d   :  { %v166_v38 = vmul.f32 %v165_v36, %v155_v37 }
 0x18f   :  { %v168_v39 = vsub.f32 %v151_v24, %v166_v38 }
 0x191   :  { %v170_v40 = vmul.f32 %v168_v39, %v168_v39 }
 0x193   :  { %v172_v41 = vsel %vm77_vm0, %v170_v40, 0.0 }
 0x194   :  { %173 = vadd.xlane.f32.xlu1 %v172_v41 }
 0x198   :  { %v158_v42 = vpop.xlane.xlu0 %157 }
 0x199   :  { %v167_v43 = vmul.f32 %v165_v36, %v158_v42 }
 0x19b   :  { %v169_v44 = vsub.f32 %v152_v28, %v167_v43 }
 0x19d   :  { %v171_v45 = vmul.f32 %v169_v44, %v169_v44 }
 0x19f   :  { %v175_v46 = vsel %vm77_vm0, %v171_v45, 0.0 }
 0x1a0   :  { %176 = vadd.xlane.f32.xlu1 %v175_v46 }
 0x207   :  { %v174_v47 = vpop.xlane.xlu1 %173 }
 0x208   :  { %v178_v48 = vmul.f32 %v174_v47, %v165_v36 }
 0x20a   :  { %v180_v49 = vadd.f32 1e-05, %v178_v48 }
 0x20c   :  { %250 = vrsqrt.f32 %v180_v49  ;;  %vm188_vm4 = vweird.f32 %v180_v49 }
 0x212   :  { %v251_v50 = vpop.eup %250 }
 0x213   :  { %v183_v51 = vmul.f32 %v251_v50, %v180_v49  ;;  %v177_v52 = vpop.xlane.xlu1 %176  ;;  %vm189_vm3 = vweird.f32 %v251_v50 }
 0x214   :  { %v179_v53 = vmul.f32 %v177_v52, %v165_v36  ;;  %vm190_vm5 = vmor %vm188_vm4, %vm189_vm3 }
 0x215   :  { %v184_v54 = vmul.f32 %v251_v50, %v183_v51 }
 0x216   :  { %v181_v55 = vadd.f32 1e-05, %v179_v53 }
 0x217   :  { %v185_v56 = vmul.f32 0.5, %v184_v54 }
 0x218   :  { %252 = vrsqrt.f32 %v181_v55  ;;  %vm198_vm7 = vweird.f32 %v181_v55 }
 0x219   :  { %v186_v57 = vsub.f32 1.5, %v185_v56 }
 0x21b   :  { %v187_v58 = vmul.f32 %v251_v50, %v186_v57 }
 0x21d   :  { %v191_v60 = vsel %vm190_vm5, %v251_v50, %v187_v58 }
 0x21e   :  { %v253_v61 = vpop.eup %252  ;;  %v202_v63 = vmul.f32 %v191_v60, %v168_v39 }
 0x21f   :  { %v193_v0 = vmul.f32 %v253_v61, %v181_v55  ;;  %vm199_vm6 = vweird.f32 %v253_v61 }
 0x220   :  { %v208_v1 = vmul.f32 %v246_v59, %v202_v63  ;;  %vm200_vm8 = vmor %vm198_vm7, %vm199_vm6 }
 0x221   :  { %v194_v2 = vmul.f32 %v253_v61, %v193_v0 }
 0x222   :  { %v214_v3 = vadd.f32 %v247_v62, %v208_v1 }
 0x223   :  { %v195_v4 = vmul.f32 0.5, %v194_v2 }
 0x224   :  { %216 = vst.msk [vmem:[%s449_s7] sm:$0xff] %vm77_vm0, %v214_v3 }
 0x225   :  { %v196_v5 = vsub.f32 1.5, %v195_v4 }
 0x227   :  { %v197_v6 = vmul.f32 %v253_v61, %v196_v5 }
 0x229   :  { %v201_v7 = vsel %vm200_vm8, %v253_v61, %v197_v6 }
 0x22a   :  { %v203_v8 = vmul.f32 %v201_v7, %v169_v44 }
 0x22c   :  { %v209_v9 = vmul.f32 %v246_v59, %v203_v8 }
 0x22e   :  { %v215_v10 = vadd.f32 %v247_v62, %v209_v9 }
 0x230   :  { %217 = vst.msk [vmem:[%s449_s7 + $0x8] sm:$0xff] %vm77_vm0, %v215_v10 }
 0x231   :  { %222 = vsyncpa [#allocation3], 1 }
 0x232   :  { %223 = vsyncpa [#allocation5], 1 }

// kernel: transformer_forward.10
= control target key start
LH: loop header
LB: loop body
LE: loop exit
PB: predicated region body
PF: predicated region fallthrough
CT: control target
= control target key end

     0   :  { %s997_s13 = smov 0   ;;  %s1117_s0 = inlined_call_operand.vmem [shape: f32[2,8,32], index: 0, kind: input, shape index: {}, may-alias: {0,1}]   ;;  %s1118_s1 = inlined_call_operand.vmem [shape: f32[2,8,32], index: 1, kind: input, shape index: {}, may-alias: {0,1}]   ;;  %s1119_s2 = inlined_call_operand.vmem [shape: f32[32,32], index: 2, kind: input, shape index: {}]   ;;  %s1120_s3 = inlined_call_operand.vmem [shape: f32[1,32], index: 3, kind: input, shape index: {}]   ;;  %s1121_s4 = inlined_call_operand.vmem [shape: f32[32,64], index: 4, kind: input, shape index: {}]   ;;  %s1122_s5 = inlined_call_operand.vmem [shape: f32[1,64], index: 5, kind: input, shape index: {}]   ;;  %s1123_s6 = inlined_call_operand.vmem [shape: f32[32,32], index: 6, kind: input, shape index: {}]   ;;  %s1124_s7 = inlined_call_operand.vmem [shape: f32[1,32], index: 7, kind: input, shape index: {}]   ;;  %s1125_s8 = inlined_call_operand.vmem [shape: f32[1,32], index: 8, kind: input, shape index: {}]   ;;  %s1126_s9 = inlined_call_operand.vmem [shape: f32[1,32], index: 9, kind: input, shape index: {}]   ;;  %s1127_s10 = inlined_call_operand.vmem [shape: f32[2,8,32], index: 10, kind: output, shape index: {}]  }
   0x1 LB: > { %s854_s14 = sadd.s32 4294967295, %s929_s13   ;;  %p858_p0 = scmp.ge.s32.totalorder %s929_s13, 1  ;;  %s929_s13 = sphi %s997_s13, %s20_s13  }
   0x2   : > { %p320_p1 = scmp.lt.s32.totalorder %s929_s13, 3 }
   0x4   : > { %p321_p2 = pnand %p858_p0, %p320_p1 }
   0x5   : > { %p360_p3 = scmp.lt.s32.totalorder (!%p321_p2), %s854_s14, 1  ;;  %s931_s23 = smov (!%p321_p2), 96  }
   0x6   : > { %324 = sbr.rel (%p321_p2) target bundleno = 1601 (0x641), region = 60  ;;  %s932_s24 = smov (!%p321_p2), 120  }
   0x7   : > { %s933_s25 = smov (!%p321_p2), 104   ;;  %s934_s26 = smov (!%p321_p2), 112  }
   0x8   : > { %s935_s27 = smov (!%p321_p2), 72   ;;  %s936_s28 = smov (!%p321_p2), 88  }
   0x9   : > { %s937_s29 = smov (!%p321_p2), 80   ;;  %s938_s30 = smov (!%p321_p2), 8  }
   0xa   : > { %s939_s12 = smov (!%p321_p2), 24   ;;  %s940_s15 = smov (!%p321_p2), 16  }
   0xb   : > { %v377_v0 = vld [vmem:[%s1119_s2 + $0x18] sm:$0xff]  ;;  %v376_v2 = vld [vmem:[%s1119_s2 + $0x10] sm:$0xff]  ;;  %v375_v4 = vld [vmem:[%s1119_s2 + $0x8] sm:$0xff]  ;;  %s1129_s14 = smov (!%p360_p3, %s854_s14), 1  ;;  %vm382_vm0 = vcmask 261120   ;;  %vm437_vm1 = vcmask 64512  }
   0xc   : > { %v409_v1 = vld [vmem:[%s1121_s4 + $0x18] sm:$0xff]  ;;  %398 = vmatpush.msra.mxu0 %v377_v0  ;;  %v408_v3 = vld [vmem:[%s1121_s4 + $0x10] sm:$0xff]  ;;  %v407_v5 = vld [vmem:[%s1121_s4 + $0x8] sm:$0xff]  ;;  %s1029_s11 = sshll.u32 %s1129_s14, 3  ;;  %vm713_vm2 = vcmask 130048   ;;  %vm715_vm3 = vcmask 195584  }
   0xd   : > { %429 = vmatpush.msra.mxu1 %v409_v1  ;;  %v374_v6 = vld [vmem:[%s1119_s2] sm:$0xff]  ;;  %s363_s16 = scalar_lea.vmem %s1117_s0, %s1029_s11  ;;  %s367_s19 = scalar_lea.vmem %s1118_s1, %s1029_s11 }
   0xe   : > { %399 = vmatpush.msra.mxu0 %v376_v2  ;;  %v406_v7 = vld [vmem:[%s1121_s4] sm:$0xff] }
   0xf   : > { %430 = vmatpush.msra.mxu1 %v408_v3  ;;  %v1035_v8 = vld [vmem:[%s363_s16] sm:$0xff] }
  0x10   : > { %400 = vmatpush.msra.mxu0 %v375_v4  ;;  %v373_v9 = vld [vmem:[%s367_s19] sm:$0xff] }
  0x11   : > { %431 = vmatpush.msra.mxu1 %v407_v5  ;;  %v898_v10 = vld [vmem:[%s1120_s3] ss:$0 sm:$0xff] }
  0x12   : > { %401 = vmatpush.msra.mxu0 %v374_v6  ;;  %v899_v11 = vld [vmem:[%s1122_s5] ss:$0 sm:$0xff] }
  0x13   : > { %432 = vmatpush.msra.mxu1 %v406_v7  ;;  %862 = vmatmul.msk.f32.vlgmr.msra.gmra.mxu0 %vm382_vm0, %v1035_v8 }
  0x14   : > { %863 = vmatmul.msk.f32.vlgmr.msra.gmra.mxu1 %vm382_vm0, %v373_v9 }
  0x90   : > { %v403_v12 = vpop.f32.mrf.mxu0 }
  0x91   : > { %v434_v13 = vpop.f32.mrf.mxu1  ;;  %v404_v14 = vadd.f32 %v898_v10, %v403_v12  ;;  %v719_v12 = vld [vmem:[%s1123_s6 + $0x10] sm:$0xff] }
  0x92   : > { %v1050_v15 = vadd.f32 %v899_v11, %v434_v13  ;;  %v720_v11 = vld [vmem:[%s1123_s6 + $0x18] sm:$0xff]  ;;  %v718_v13 = vld [vmem:[%s1123_s6 + $0x8] sm:$0xff] }
  0x93   : > { %502 = vrot.lane.b32.xlu2 %v404_v14, %s932_s24 }
  0x94   : > { %476 = vrot.lane.b32.xlu1 %v1050_v15, %s931_s23  ;;  %864 = vmatpush.xpose.msk.msra.mxu2 %vm437_vm1, %v1050_v15 }
  0x97   : > { %865 = vmatmul.msk.f32.vlgmr.msra.gmra.mxu2 %vm437_vm1, %v404_v14 }
  0x9b   : > { %636 = vrot.lane.b32.xlu2 %v1050_v15, %s933_s25 }
  0x9c   : > { %504 = vrot.lane.b32.xlu1 %v1050_v15, %s932_s24 }
  0xa3   : > { %568 = vrot.lane.b32.xlu2 %v404_v14, %s934_s26 }
  0xa4   : > { %570 = vrot.lane.b32.xlu1 %v1050_v15, %s934_s26 }
  0xed   : > { %v503_v16 = vpop.permute.xlu2 %502 }
  0xf5   : > { %v637_v19 = vpop.permute.xlu2 %636 }
  0xfd   : > { %v569_v21 = vpop.permute.xlu2 %568 }
 0x106   : > { %v477_v17 = vpop.permute.xlu1 %476 }
 0x107   : > { %497 = vmatpush.msra.mxu3 %v477_v17 }
 0x10e   : > { %v505_v18 = vpop.permute.xlu1 %504 }
 0x10f   : > { %867 = vmatpush.xpose.msk.msrb.mxu3 %vm437_vm1, %v505_v18 }
 0x116   : > { %v571_v20 = vpop.permute.xlu1 %570 }
 0x117   : > { %870 = vmatpush.xpose.msk.msrb.mxu0 %vm437_vm1, %v571_v20 }
 0x11a   : > { %v461_v22 = vpop.f32.mrf.mxu2  ;;  %871 = vmatmul.msk.f32.vlgmr.msrb.gmra.mxu0 %vm437_vm1, %v569_v21  ;;  %v900_v21 = vld [vmem:[%s1124_s7] ss:$0 sm:$0xff] }
 0x11b   : > { %v464_v23 = vmul.f32 0.35355338, %v461_v22  ;;  %740 = vmatpush.msra.mxu0 %v720_v11 }
 0x11d   : > { %v465_v24 = vsel %vm437_vm1, %v464_v23, -inf  ;;  %741 = vmatpush.msra.mxu0 %v719_v12 }
 0x11e   : > { %466 = vmax.xlane.f32.xlu0 %v465_v24 }
 0x11f   : > { %742 = vmatpush.msra.mxu0 %v718_v13 }
 0x191   : > { %v467_v25 = vpop.xlane.xlu0 %466 }
 0x192   : > { %v468_v26 = vsub.f32 %v464_v23, %v467_v25 }
 0x194   : > { %v469_v27 = vmul.f32 1.442695, %v468_v26  ;;  %v941_v26 = vmov 32.0  }
 0x196   : > { %903 = vpow2.f32 %v469_v27 }
 0x197   : > { %v593_v30 = vpop.f32.mrf.mxu0 }
 0x198   : > { %v596_v31 = vmul.f32 0.35355338, %v593_v30 }
 0x19a   : > { %v597_v32 = vsel %vm437_vm1, %v596_v31, -inf }
 0x19c   : > { %v904_v28 = vpop.eup %903 }
 0x19d   : > { %v471_v29 = vsel %vm437_vm1, %v904_v28, 0.0 }
 0x19e   : > { %472 = vadd.xlane.f32.xlu0 %v471_v29 }
 0x1b2   : > { %634 = vrot.lane.b32.xlu0 %v404_v14, %s933_s25  ;;  %v717_v14 = vld [vmem:[%s1123_s6] sm:$0xff] }
 0x1b3   : > { %743 = vmatpush.msra.mxu0 %v717_v14 }
 0x1dc   : > { %598 = vmax.xlane.f32.xlu0 %v597_v32 }
 0x1f0   : > { %674 = vrot.lane.b32.xlu0 %v1050_v15, %s935_s27 }
 0x211   : > { %v473_v33 = vpop.xlane.xlu0 %472 }
 0x212   : > { %905 = vrcp.f32 %v473_v33 }
 0x218   : > { %v906_v34 = vpop.eup %905 }
 0x219   : > { %v475_v35 = vmul.f32 %v906_v34, %v904_v28 }
 0x21b   : > { %866 = vmatmul.msk.f32.vlgmr.msra.gmra.mxu3 %vm437_vm1, %v475_v35 }
 0x21c   : > { %873 = vmatpush.xpose.msk.msra.mxu3 %vm437_vm1, %v637_v19 }
 0x223   : > { %868 = vmatmul.msk.f32.vlgmr.msrb.gmra.mxu3 %vm437_vm1, %v503_v16 }
 0x224   : > { %v635_v36 = vpop.permute.xlu0 %634 }
 0x22b   : > { %874 = vmatmul.msk.f32.vlgmr.msra.gmra.mxu3 %vm437_vm1, %v635_v36 }
 0x24f   : > { %v599_v37 = vpop.xlane.xlu0 %598 }
 0x250   : > { %v600_v39 = vsub.f32 %v596_v31, %v599_v37 }
 0x252   : > { %v601_v40 = vmul.f32 1.442695, %v600_v39 }
 0x254   : > { %907 = vpow2.f32 %v601_v40 }
 0x25a   : > { %v908_v44 = vpop.eup %907 }
 0x25b   : > { %v603_v48 = vsel %vm437_vm1, %v908_v44, 0.0 }
 0x262   : > { %v675_v1 = vpop.permute.xlu0 %674 }
 0x29e   : > { %v1070_v38 = vpop.f32.mrf.mxu3 }
 0x2a6   : > { %v527_v41 = vpop.f32.mrf.mxu3 }
 0x2a7   : > { %v530_v42 = vmul.f32 0.35355338, %v527_v41 }
 0x2a9   : > { %v531_v43 = vsel %vm437_vm1, %v530_v42, -inf }
 0x2aa   : > { %532 = vmax.xlane.f32.xlu1 %v531_v43 }
 0x2ae   : > { %v659_v45 = vpop.f32.mrf.mxu3 }
 0x2af   : > { %v662_v46 = vmul.f32 0.35355338, %v659_v45 }
 0x2b1   : > { %v663_v47 = vsel %vm437_vm1, %v662_v46, -inf }
 0x2b2   : > { %664 = vmax.xlane.f32.xlu2 %v663_v47  ;;  %604 = vadd.xlane.f32.xlu1 %v603_v48  ;;  %v902_v48 = vld [vmem:[%s1126_s9] ss:$0 sm:$0xff] }
 0x31d   : > { %v533_v49 = vpop.xlane.xlu1 %532 }
 0x31e   : > { %v534_v50 = vsub.f32 %v530_v42, %v533_v49 }
 0x320   : > { %v535_v51 = vmul.f32 1.442695, %v534_v50 }
 0x322   : > { %909 = vpow2.f32 %v535_v51 }
 0x325   : > { %v665_v52 = vpop.xlane.xlu2 %664  ;;  %v605_v59 = vpop.xlane.xlu1 %604 }
 0x326   : > { %v666_v53 = vsub.f32 %v662_v46, %v665_v52  ;;  %v901_v46 = vld [vmem:[%s1125_s8] ss:$0 sm:$0xff] }
 0x328   : > { %v910_v54 = vpop.eup %909  ;;  %v667_v55 = vmul.f32 1.442695, %v666_v53 }
 0x329   : > { %v537_v56 = vsel %vm437_vm1, %v910_v54, 0.0 }
 0x32a   : > { %911 = vpow2.f32 %v667_v55  ;;  %538 = vadd.xlane.f32.xlu2 %v537_v56 }
 0x330   : > { %v912_v57 = vpop.eup %911 }
 0x331   : > { %v669_v58 = vsel %vm437_vm1, %v912_v57, 0.0 }
 0x332   : > { %670 = vadd.xlane.f32.xlu1 %v669_v58 }
 0x342   : > { %542 = vrot.lane.b32.xlu2 %v1050_v15, %s936_s28 }
 0x34b   : > { %608 = vrot.lane.b32.xlu1 %v1050_v15, %s937_s29 }
 0x39d   : > { %v539_v60 = vpop.xlane.xlu2 %538 }
 0x39e   : > { %913 = vrcp.f32 %v539_v60 }
 0x3a4   : > { %v914_v61 = vpop.eup %913 }
 0x3a5   : > { %v543_v62 = vpop.permute.xlu2 %542  ;;  %v671_v63 = vpop.xlane.xlu1 %670  ;;  %v541_v0 = vmul.f32 %v914_v61, %v910_v54 }
 0x3a6   : > { %915 = vrcp.f32 %v671_v63  ;;  %563 = vmatpush.msrb.mxu2 %v543_v62 }
 0x3a7   : > { %869 = vmatmul.msk.f32.vlgmr.msrb.gmra.mxu2 %vm437_vm1, %v541_v0  ;;  %917 = vrcp.f32 %v605_v59 }
 0x3a8   : > { %695 = vmatpush.msra.mxu2 %v675_v1  ;;  %919 = vrcp.f32 %v941_v26 }
 0x3ac   : > { %v916_v2 = vpop.eup %915 }
 0x3ad   : > { %v673_v3 = vmul.f32 %v916_v2, %v912_v57  ;;  %v918_v4 = vpop.eup %917 }
 0x3ae   : > { %v607_v6 = vmul.f32 %v918_v4, %v908_v44  ;;  %v920_v27 = vpop.eup %919 }
 0x3af   : > { %875 = vmatmul.msk.f32.vlgmr.msra.gmra.mxu2 %vm437_vm1, %v673_v3  ;;  %v753_v28 = vmul.f32 32.0, %v920_v27  ;;  %vm757_vm4 = vweird.f32 %v920_v27 }
 0x3b1   : > { %v754_v29 = vsub.f32 1.0, %v753_v28 }
 0x3b3   : > { %v755_v30 = vmul.f32 %v920_v27, %v754_v29 }
 0x3b5   : > { %v756_v31 = vadd.f32 %v920_v27, %v755_v30 }
 0x3b7   : > { %v758_v32 = vsel %vm757_vm4, %v920_v27, %v756_v31 }
 0x3bd   : > { %v609_v5 = vpop.permute.xlu1 %608 }
 0x3be   : > { %629 = vmatpush.msrb.mxu1 %v609_v5 }
 0x3bf   : > { %872 = vmatmul.msk.f32.vlgmr.msrb.gmra.mxu1 %vm437_vm1, %v607_v6 }
 0x42a   : > { %v565_v7 = vpop.f32.mrf.mxu2 }
 0x42b   : > { %701 = vrot.lane.b32.xlu2 %v565_v7, %s938_s30 }
 0x432   : > { %v697_v9 = vpop.f32.mrf.mxu2 }
 0x433   : > { %709 = vrot.lane.b32.xlu2 %v697_v9, %s939_s12  ;;  %s371_s12 = scalar_lea.vmem %s1127_s10, %s1029_s11 }
 0x43c   : > { %v631_v10 = vpop.f32.mrf.mxu1 }
 0x43d   : > { %705 = vrot.lane.b32.xlu0 %v631_v10, %s940_s15 }
 0x485   : > { %v702_v15 = vpop.permute.xlu2 %701 }
 0x486   : > { %v712_v16 = vsel %vm437_vm1, %v1070_v38, %v702_v15 }
 0x48d   : > { %v710_v18 = vpop.permute.xlu2 %709 }
 0x4af   : > { %v706_v17 = vpop.permute.xlu0 %705 }
 0x4b0   : > { %v714_v19 = vsel %vm713_vm2, %v712_v16, %v706_v17 }
 0x4b1   : > { %v716_v20 = vsel %vm715_vm3, %v714_v19, %v710_v18 }
 0x4b2   : > { %876 = vmatmul.msk.f32.vlgmr.msra.gmra.mxu0 %vm382_vm0, %v716_v20 }
 0x52f   : > { %v745_v22 = vpop.f32.mrf.mxu0 }
 0x530   : > { %v746_v23 = vadd.f32 %v900_v21, %v745_v22 }
 0x532   : > { %v748_v24 = vadd.f32 %v746_v23, %v1035_v8 }
 0x534   : > { %v749_v25 = vsel %vm382_vm0, %v748_v24, 0.0 }
 0x535   : > { %750 = vadd.xlane.f32.xlu0 %v749_v25 }
 0x5a8   : > { %v751_v33 = vpop.xlane.xlu0 %750 }
 0x5a9   : > { %v759_v34 = vmul.f32 %v758_v32, %v751_v33 }
 0x5ab   : > { %v760_v35 = vsub.f32 %v748_v24, %v759_v34 }
 0x5ad   : > { %v761_v36 = vmul.f32 %v760_v35, %v760_v35 }
 0x5af   : > { %v762_v37 = vsel %vm382_vm0, %v761_v36, 0.0 }
 0x5b0   : > { %763 = vadd.xlane.f32.xlu1 %v762_v37 }
 0x623   : > { %v764_v8 = vpop.xlane.xlu1 %763 }
 0x624   : > { %v765_v38 = vmul.f32 %v764_v8, %v758_v32 }
 0x626   : > { %v766_v39 = vadd.f32 1e-05, %v765_v38 }
 0x628   : > { %921 = vrsqrt.f32 %v766_v39  ;;  %vm773_vm6 = vweird.f32 %v766_v39 }
 0x62e   : > { %v922_v40 = vpop.eup %921 }
 0x62f   : > { %v768_v41 = vmul.f32 %v922_v40, %v766_v39  ;;  %vm774_vm5 = vweird.f32 %v922_v40 }
 0x630   : > { %vm775_vm7 = vmor %vm773_vm6, %vm774_vm5 }
 0x631   : > { %v769_v42 = vmul.f32 %v922_v40, %v768_v41 }
 0x633   : > { %v770_v43 = vmul.f32 0.5, %v769_v42 }
 0x635   : > { %v771_v44 = vsub.f32 1.5, %v770_v43 }
 0x637   : > { %v772_v45 = vmul.f32 %v922_v40, %v771_v44 }
 0x639   : > { %v776_v47 = vsel %vm775_vm7, %v922_v40, %v772_v45 }
 0x63a   : > { %v777_v49 = vmul.f32 %v776_v47, %v760_v35 }
 0x63c   : > { %v782_v50 = vmul.f32 %v901_v46, %v777_v49 }
 0x63e   : > { %v787_v51 = vadd.f32 %v902_v48, %v782_v50 }
 0x640   : > { %788 = vst.msk [vmem:[%s371_s12] sm:$0xff] %vm382_vm0, %v787_v51 }
 0x641 PF: > { %s20_s13 = sadd.s32 1, %s929_s13  }
 0x642   : > { %p17_p4 = scmp.ge.s32.totalorder %s20_s13, 4  }
 0x644   :  { %19 = sbr.rel (!%p17_p4) target bundleno = 1 (0x1), region = 93 }

// kernel: transformer_forward.14
= control target key start
LH: loop header
LB: loop body
LE: loop exit
PB: predicated region body
PF: predicated region fallthrough
CT: control target
= control target key end

     0   :  { %s1034_s17 = smov 0   ;;  %s1157_s0 = inlined_call_operand.vmem [shape: f32[2,8,32], index: 0, kind: input, shape index: {}, may-alias: {0,1}]   ;;  %s1158_s1 = inlined_call_operand.vmem [shape: f32[2,8,32], index: 1, kind: input, shape index: {}, may-alias: {0,1}]   ;;  %s1159_s2 = inlined_call_operand.vmem [shape: f32[32,32], index: 2, kind: input, shape index: {}]   ;;  %s1160_s3 = inlined_call_operand.vmem [shape: f32[1,32], index: 3, kind: input, shape index: {}]   ;;  %s1161_s4 = inlined_call_operand.vmem [shape: f32[32,64], index: 4, kind: input, shape index: {}]   ;;  %s1162_s5 = inlined_call_operand.vmem [shape: f32[1,64], index: 5, kind: input, shape index: {}]   ;;  %s1163_s6 = inlined_call_operand.vmem [shape: f32[32,32], index: 6, kind: input, shape index: {}]   ;;  %s1164_s7 = inlined_call_operand.vmem [shape: f32[1,32], index: 7, kind: input, shape index: {}]   ;;  %s1165_s8 = inlined_call_operand.vmem [shape: f32[1,32], index: 8, kind: input, shape index: {}]   ;;  %s1166_s9 = inlined_call_operand.vmem [shape: f32[1,32], index: 9, kind: input, shape index: {}]   ;;  %s1167_s10 = inlined_call_operand.vmem [shape: f32[8,8], index: 10, kind: input, shape index: {}]   ;;  %s1168_s11 = inlined_call_operand.vmem [shape: f32[2,8,32], index: 11, kind: output, shape index: {}]  }
   0x1 LB: > { %s886_s18 = sadd.s32 4294967295, %s961_s17   ;;  %p890_p0 = scmp.ge.s32.totalorder %s961_s17, 1  ;;  %s961_s17 = sphi %s1034_s17, %s21_s17  }
   0x2   : > { %p345_p1 = scmp.lt.s32.totalorder %s961_s17, 3 }
   0x4   : > { %p346_p2 = pnand %p890_p0, %p345_p1 }
   0x5   : > { %p387_p3 = scmp.lt.s32.totalorder (!%p346_p2), %s886_s18, 1  ;;  %s963_s28 = smov (!%p346_p2), 96  }
   0x6   : > { %349 = sbr.rel (%p346_p2) target bundleno = 1605 (0x645), region = 64  ;;  %s964_s29 = smov (!%p346_p2), 120  }
   0x7   : > { %s965_s30 = smov (!%p346_p2), 104   ;;  %s966_s12 = smov (!%p346_p2), 112  }
   0x8   : > { %s967_s15 = smov (!%p346_p2), 72   ;;  %s968_s19 = smov (!%p346_p2), 88  }
   0x9   : > { %s969_s20 = smov (!%p346_p2), 80   ;;  %s971_s22 = smov (!%p346_p2), 24  }
   0xa   : > { %s972_s23 = smov (!%p346_p2), 16  }
   0xb   : > { %v404_v0 = vld [vmem:[%s1159_s2 + $0x18] sm:$0xff]  ;;  %v403_v2 = vld [vmem:[%s1159_s2 + $0x10] sm:$0xff]  ;;  %v402_v4 = vld [vmem:[%s1159_s2 + $0x8] sm:$0xff]  ;;  %s1170_s18 = smov (!%p387_p3, %s886_s18), 1  ;;  %vm409_vm0 = vcmask 261120   ;;  %vm464_vm1 = vcmask 64512  }
   0xc   : > { %v436_v1 = vld [vmem:[%s1161_s4 + $0x18] sm:$0xff]  ;;  %425 = vmatpush.msra.mxu0 %v404_v0  ;;  %v435_v3 = vld [vmem:[%s1161_s4 + $0x10] sm:$0xff]  ;;  %v434_v5 = vld [vmem:[%s1161_s4 + $0x8] sm:$0xff]  ;;  %s1066_s16 = sshll.u32 %s1170_s18, 3  ;;  %vm745_vm2 = vcmask 130048   ;;  %vm747_vm3 = vcmask 195584  }
   0xd   : > { %456 = vmatpush.msra.mxu1 %v436_v1  ;;  %v401_v6 = vld [vmem:[%s1159_s2] sm:$0xff]  ;;  %s390_s21 = scalar_lea.vmem %s1157_s0, %s1066_s16  ;;  %s394_s24 = scalar_lea.vmem %s1158_s1, %s1066_s16 }
   0xe   : > { %426 = vmatpush.msra.mxu0 %v403_v2  ;;  %v433_v7 = vld [vmem:[%s1161_s4] sm:$0xff] }
   0xf   : > { %457 = vmatpush.msra.mxu1 %v435_v3  ;;  %v1072_v8 = vld [vmem:[%s390_s21] sm:$0xff]  ;;  %s970_s21 = smov 8  }
  0x10   : > { %427 = vmatpush.msra.mxu0 %v402_v4  ;;  %v400_v9 = vld [vmem:[%s394_s24] sm:$0xff] }
  0x11   : > { %458 = vmatpush.msra.mxu1 %v434_v5  ;;  %v930_v10 = vld [vmem:[%s1160_s3] ss:$0 sm:$0xff] }
  0x12   : > { %428 = vmatpush.msra.mxu0 %v401_v6  ;;  %v931_v11 = vld [vmem:[%s1162_s5] ss:$0 sm:$0xff] }
  0x13   : > { %459 = vmatpush.msra.mxu1 %v433_v7  ;;  %894 = vmatmul.msk.f32.vlgmr.msra.gmra.mxu0 %vm409_vm0, %v1072_v8  ;;  %v492_v23 = vld [vmem:[%s1167_s10] sm:$0xff] }
  0x14   : > { %895 = vmatmul.msk.f32.vlgmr.msra.gmra.mxu1 %vm409_vm0, %v400_v9 }
  0x90   : > { %v430_v12 = vpop.f32.mrf.mxu0 }
  0x91   : > { %v461_v13 = vpop.f32.mrf.mxu1  ;;  %v431_v14 = vadd.f32 %v930_v10, %v430_v12 }
  0x92   : > { %v1087_v15 = vadd.f32 %v931_v11, %v461_v13 }
  0x93   : > { %531 = vrot.lane.b32.xlu2 %v431_v14, %s964_s29 }
  0x94   : > { %505 = vrot.lane.b32.xlu1 %v1087_v15, %s963_s28  ;;  %896 = vmatpush.xpose.msk.msra.mxu2 %vm464_vm1, %v1087_v15 }
  0x97   : > { %897 = vmatmul.msk.f32.vlgmr.msra.gmra.mxu2 %vm464_vm1, %v431_v14 }
  0x9b   : > { %667 = vrot.lane.b32.xlu2 %v1087_v15, %s965_s30 }
  0x9c   : > { %533 = vrot.lane.b32.xlu1 %v1087_v15, %s964_s29 }
  0xa3   : > { %598 = vrot.lane.b32.xlu2 %v431_v14, %s966_s12 }
  0xa4   : > { %600 = vrot.lane.b32.xlu1 %v1087_v15, %s966_s12 }
  0xed   : > { %v532_v16 = vpop.permute.xlu2 %531 }
  0xf5   : > { %v668_v19 = vpop.permute.xlu2 %667 }
  0xfd   : > { %v599_v21 = vpop.permute.xlu2 %598 }
 0x106   : > { %v506_v17 = vpop.permute.xlu1 %505 }
 0x107   : > { %526 = vmatpush.msra.mxu3 %v506_v17  ;;  %v751_v17 = vld [vmem:[%s1163_s6 + $0x10] sm:$0xff] }
 0x10e   : > { %v534_v18 = vpop.permute.xlu1 %533 }
 0x10f   : > { %899 = vmatpush.xpose.msk.msrb.mxu3 %vm464_vm1, %v534_v18  ;;  %v750_v18 = vld [vmem:[%s1163_s6 + $0x8] sm:$0xff] }
 0x116   : > { %v601_v20 = vpop.permute.xlu1 %600 }
 0x117   : > { %902 = vmatpush.xpose.msk.msrb.mxu0 %vm464_vm1, %v601_v20 }
 0x11a   : > { %v488_v22 = vpop.f32.mrf.mxu2  ;;  %903 = vmatmul.msk.f32.vlgmr.msrb.gmra.mxu0 %vm464_vm1, %v599_v21 }
 0x11b   : > { %v491_v24 = vmul.f32 0.35355338, %v488_v22 }
 0x11d   : > { %v493_v25 = vadd.f32 %v492_v23, %v491_v24 }
 0x11f   : > { %v494_v26 = vsel %vm464_vm1, %v493_v25, -inf }
 0x120   : > { %495 = vmax.xlane.f32.xlu0 %v494_v26  ;;  %v932_v26 = vld [vmem:[%s1164_s7] ss:$0 sm:$0xff] }
 0x193   : > { %v496_v27 = vpop.xlane.xlu0 %495 }
 0x194   : > { %v497_v28 = vsub.f32 %v493_v25, %v496_v27 }
 0x196   : > { %v498_v29 = vmul.f32 1.442695, %v497_v28 }
 0x197   : > { %v623_v32 = vpop.f32.mrf.mxu0 }
 0x198   : > { %935 = vpow2.f32 %v498_v29  ;;  %v626_v33 = vmul.f32 0.35355338, %v623_v32 }
 0x19a   : > { %v627_v34 = vadd.f32 %v626_v33, %v492_v23 }
 0x19c   : > { %v628_v35 = vsel %vm464_vm1, %v627_v34, -inf }
 0x19e   : > { %v936_v30 = vpop.eup %935 }
 0x19f   : > { %v500_v31 = vsel %vm464_vm1, %v936_v30, 0.0 }
 0x1a0   : > { %501 = vadd.xlane.f32.xlu0 %v500_v31  ;;  %v973_v31 = vmov 32.0  }
 0x1b4   : > { %665 = vrot.lane.b32.xlu0 %v431_v14, %s965_s30 }
 0x1de   : > { %629 = vmax.xlane.f32.xlu0 %v628_v35 }
 0x1f2   : > { %706 = vrot.lane.b32.xlu0 %v1087_v15, %s967_s15 }
 0x213   : > { %v502_v36 = vpop.xlane.xlu0 %501 }
 0x214   : > { %937 = vrcp.f32 %v502_v36 }
 0x21a   : > { %v938_v37 = vpop.eup %937 }
 0x21b   : > { %v504_v38 = vmul.f32 %v938_v37, %v936_v30 }
 0x21d   : > { %898 = vmatmul.msk.f32.vlgmr.msra.gmra.mxu3 %vm464_vm1, %v504_v38 }
 0x21e   : > { %905 = vmatpush.xpose.msk.msra.mxu3 %vm464_vm1, %v668_v19  ;;  %v749_v19 = vld [vmem:[%s1163_s6] sm:$0xff] }
 0x225   : > { %900 = vmatmul.msk.f32.vlgmr.msrb.gmra.mxu3 %vm464_vm1, %v532_v16  ;;  %v752_v16 = vld [vmem:[%s1163_s6 + $0x18] sm:$0xff] }
 0x226   : > { %v666_v39 = vpop.permute.xlu0 %665  ;;  %772 = vmatpush.msra.mxu0 %v752_v16 }
 0x228   : > { %773 = vmatpush.msra.mxu0 %v751_v17 }
 0x22a   : > { %774 = vmatpush.msra.mxu0 %v750_v18 }
 0x22c   : > { %775 = vmatpush.msra.mxu0 %v749_v19 }
 0x22d   : > { %906 = vmatmul.msk.f32.vlgmr.msra.gmra.mxu3 %vm464_vm1, %v666_v39 }
 0x251   : > { %v630_v41 = vpop.xlane.xlu0 %629 }
 0x252   : > { %v631_v42 = vsub.f32 %v627_v34, %v630_v41 }
 0x254   : > { %v632_v43 = vmul.f32 1.442695, %v631_v42 }
 0x256   : > { %939 = vpow2.f32 %v632_v43 }
 0x25c   : > { %v940_v50 = vpop.eup %939 }
 0x25d   : > { %v634_v53 = vsel %vm464_vm1, %v940_v50, 0.0 }
 0x264   : > { %v707_v6 = vpop.permute.xlu0 %706 }
 0x2a0   : > { %v1110_v40 = vpop.f32.mrf.mxu3 }
 0x2a8   : > { %v556_v44 = vpop.f32.mrf.mxu3 }
 0x2a9   : > { %v559_v45 = vmul.f32 0.35355338, %v556_v44 }
 0x2ab   : > { %v560_v46 = vadd.f32 %v559_v45, %v492_v23 }
 0x2ad   : > { %v561_v47 = vsel %vm464_vm1, %v560_v46, -inf }
 0x2ae   : > { %562 = vmax.xlane.f32.xlu1 %v561_v47 }
 0x2b0   : > { %v690_v48 = vpop.f32.mrf.mxu3 }
 0x2b1   : > { %v693_v49 = vmul.f32 0.35355338, %v690_v48 }
 0x2b3   : > { %v694_v51 = vadd.f32 %v693_v49, %v492_v23 }
 0x2b5   : > { %v695_v52 = vsel %vm464_vm1, %v694_v51, -inf }
 0x2b6   : > { %696 = vmax.xlane.f32.xlu2 %v695_v52  ;;  %635 = vadd.xlane.f32.xlu1 %v634_v53  ;;  %v934_v53 = vld [vmem:[%s1166_s9] ss:$0 sm:$0xff] }
 0x321   : > { %v563_v54 = vpop.xlane.xlu1 %562 }
 0x322   : > { %v564_v55 = vsub.f32 %v560_v46, %v563_v54 }
 0x324   : > { %v565_v56 = vmul.f32 1.442695, %v564_v55 }
 0x326   : > { %941 = vpow2.f32 %v565_v56 }
 0x329   : > { %v697_v57 = vpop.xlane.xlu2 %696  ;;  %v636_v0 = vpop.xlane.xlu1 %635 }
 0x32a   : > { %v698_v58 = vsub.f32 %v694_v51, %v697_v57  ;;  %v933_v51 = vld [vmem:[%s1165_s8] ss:$0 sm:$0xff] }
 0x32c   : > { %v942_v59 = vpop.eup %941  ;;  %v699_v60 = vmul.f32 1.442695, %v698_v58 }
 0x32d   : > { %v567_v61 = vsel %vm464_vm1, %v942_v59, 0.0 }
 0x32e   : > { %943 = vpow2.f32 %v699_v60  ;;  %568 = vadd.xlane.f32.xlu2 %v567_v61 }
 0x334   : > { %v944_v62 = vpop.eup %943 }
 0x335   : > { %v701_v63 = vsel %vm464_vm1, %v944_v62, 0.0 }
 0x336   : > { %702 = vadd.xlane.f32.xlu1 %v701_v63 }
 0x346   : > { %572 = vrot.lane.b32.xlu2 %v1087_v15, %s968_s19 }
 0x34f   : > { %639 = vrot.lane.b32.xlu1 %v1087_v15, %s969_s20 }
 0x3a1   : > { %v569_v1 = vpop.xlane.xlu2 %568 }
 0x3a2   : > { %945 = vrcp.f32 %v569_v1 }
 0x3a8   : > { %v946_v2 = vpop.eup %945 }
 0x3a9   : > { %v573_v3 = vpop.permute.xlu2 %572  ;;  %v703_v4 = vpop.xlane.xlu1 %702  ;;  %v571_v5 = vmul.f32 %v946_v2, %v942_v59 }
 0x3aa   : > { %947 = vrcp.f32 %v703_v4  ;;  %593 = vmatpush.msrb.mxu2 %v573_v3 }
 0x3ab   : > { %901 = vmatmul.msk.f32.vlgmr.msrb.gmra.mxu2 %vm464_vm1, %v571_v5  ;;  %949 = vrcp.f32 %v636_v0 }
 0x3ac   : > { %727 = vmatpush.msra.mxu2 %v707_v6  ;;  %951 = vrcp.f32 %v973_v31 }
 0x3b0   : > { %v948_v7 = vpop.eup %947 }
 0x3b1   : > { %v705_v9 = vmul.f32 %v948_v7, %v944_v62  ;;  %v950_v10 = vpop.eup %949 }
 0x3b2   : > { %v638_v12 = vmul.f32 %v950_v10, %v940_v50  ;;  %v952_v32 = vpop.eup %951 }
 0x3b3   : > { %907 = vmatmul.msk.f32.vlgmr.msra.gmra.mxu2 %vm464_vm1, %v705_v9  ;;  %v785_v33 = vmul.f32 32.0, %v952_v32  ;;  %vm789_vm4 = vweird.f32 %v952_v32 }
 0x3b5   : > { %v786_v34 = vsub.f32 1.0, %v785_v33 }
 0x3b7   : > { %v787_v35 = vmul.f32 %v952_v32, %v786_v34 }
 0x3b9   : > { %v788_v36 = vadd.f32 %v952_v32, %v787_v35 }
 0x3bb   : > { %v790_v37 = vsel %vm789_vm4, %v952_v32, %v788_v36 }
 0x3c1   : > { %v640_v11 = vpop.permute.xlu1 %639 }
 0x3c2   : > { %660 = vmatpush.msrb.mxu1 %v640_v11 }
 0x3c3   : > { %904 = vmatmul.msk.f32.vlgmr.msrb.gmra.mxu1 %vm464_vm1, %v638_v12 }
 0x42e   : > { %v595_v13 = vpop.f32.mrf.mxu2 }
 0x42f   : > { %733 = vrot.lane.b32.xlu2 %v595_v13, %s970_s21 }
 0x436   : > { %v729_v14 = vpop.f32.mrf.mxu2 }
 0x437   : > { %741 = vrot.lane.b32.xlu2 %v729_v14, %s971_s22 }
 0x440   : > { %v662_v15 = vpop.f32.mrf.mxu1 }
 0x441   : > { %737 = vrot.lane.b32.xlu0 %v662_v15, %s972_s23  ;;  %s398_s23 = scalar_lea.vmem %s1168_s11, %s1066_s16 }
 0x489   : > { %v734_v20 = vpop.permute.xlu2 %733 }
 0x48a   : > { %v744_v21 = vsel %vm464_vm1, %v1110_v40, %v734_v20 }
 0x491   : > { %v742_v23 = vpop.permute.xlu2 %741 }
 0x4b3   : > { %v738_v22 = vpop.permute.xlu0 %737 }
 0x4b4   : > { %v746_v24 = vsel %vm745_vm2, %v744_v21, %v738_v22 }
 0x4b5   : > { %v748_v25 = vsel %vm747_vm3, %v746_v24, %v742_v23 }
 0x4b6   : > { %908 = vmatmul.msk.f32.vlgmr.msra.gmra.mxu0 %vm409_vm0, %v748_v25 }
 0x533   : > { %v777_v27 = vpop.f32.mrf.mxu0 }
 0x534   : > { %v778_v28 = vadd.f32 %v932_v26, %v777_v27 }
 0x536   : > { %v780_v29 = vadd.f32 %v778_v28, %v1072_v8 }
 0x538   : > { %v781_v30 = vsel %vm409_vm0, %v780_v29, 0.0 }
 0x539   : > { %782 = vadd.xlane.f32.xlu0 %v781_v30 }
 0x5ac   : > { %v783_v38 = vpop.xlane.xlu0 %782 }
 0x5ad   : > { %v791_v39 = vmul.f32 %v790_v37, %v783_v38 }
 0x5af   : > { %v792_v40 = vsub.f32 %v780_v29, %v791_v39 }
 0x5b1   : > { %v793_v41 = vmul.f32 %v792_v40, %v792_v40 }
 0x5b3   : > { %v794_v42 = vsel %vm409_vm0, %v793_v41, 0.0 }
 0x5b4   : > { %795 = vadd.xlane.f32.xlu1 %v794_v42 }
 0x627   : > { %v796_v8 = vpop.xlane.xlu1 %795 }
 0x628   : > { %v797_v43 = vmul.f32 %v796_v8, %v790_v37 }
 0x62a   : > { %v798_v44 = vadd.f32 1e-05, %v797_v43 }
 0x62c   : > { %953 = vrsqrt.f32 %v798_v44  ;;  %vm805_vm6 = vweird.f32 %v798_v44 }
 0x632   : > { %v954_v45 = vpop.eup %953 }
 0x633   : > { %v800_v46 = vmul.f32 %v954_v45, %v798_v44  ;;  %vm806_vm5 = vweird.f32 %v954_v45 }
 0x634   : > { %vm807_vm7 = vmor %vm805_vm6, %vm806_vm5 }
 0x635   : > { %v801_v47 = vmul.f32 %v954_v45, %v800_v46 }
 0x637   : > { %v802_v48 = vmul.f32 0.5, %v801_v47 }
 0x639   : > { %v803_v49 = vsub.f32 1.5, %v802_v48 }
 0x63b   : > { %v804_v50 = vmul.f32 %v954_v45, %v803_v49 }
 0x63d   : > { %v808_v52 = vsel %vm807_vm7, %v954_v45, %v804_v50 }
 0x63e   : > { %v809_v54 = vmul.f32 %v808_v52, %v792_v40 }
 0x640   : > { %v814_v55 = vmul.f32 %v933_v51, %v809_v54 }
 0x642   : > { %v819_v56 = vadd.f32 %v934_v53, %v814_v55 }
 0x644   : > { %820 = vst.msk [vmem:[%s398_s23] sm:$0xff] %vm409_vm0, %v819_v56 }
 0x645 PF: > { %s21_s17 = sadd.s32 1, %s961_s17  }
 0x646   : > { %p18_p4 = scmp.ge.s32.totalorder %s21_s17, 4  }
 0x648   :  { %20 = sbr.rel (!%p18_p4) target bundleno = 1 (0x1), region = 97 }

// kernel: transformer_forward.11
= control target key start
LH: loop header
LB: loop body
LE: loop exit
PB: predicated region body
PF: predicated region fallthrough
CT: control target
= control target key end

     0   :  { %vm36_vm0 = vcmask 261120   ;;  %vm80_vm1 = vcmask 523264   ;;  %v208_v30 = vmov 32.0   ;;  %s317_s1 = inlined_call_operand.vmem [shape: f32[32,64], index: 1, kind: input, shape index: {}]   ;;  %s318_s3 = inlined_call_operand.vmem [shape: f32[64,32], index: 3, kind: input, shape index: {}]   ;;  %s319_s0 = inlined_call_operand.vmem [shape: f32[16,32], index: 0, kind: input, shape index: {}]   ;;  %s320_s2 = inlined_call_operand.vmem [shape: f32[1,64], index: 2, kind: input, shape index: {}]   ;;  %s321_s4 = inlined_call_operand.vmem [shape: f32[1,32], index: 4, kind: input, shape index: {}]   ;;  %s322_s5 = inlined_call_operand.vmem [shape: f32[1,32], index: 5, kind: input, shape index: {}]   ;;  %s323_s6 = inlined_call_operand.vmem [shape: f32[1,32], index: 6, kind: input, shape index: {}]   ;;  %s324_s7 = inlined_call_operand.vmem [shape: f32[16,32], index: 7, kind: output, shape index: {}]  }
   0x1   :  { %v31_v0 = vld [vmem:[%s317_s1 + $0x18] sm:$0xff]  ;;  %v30_v1 = vld [vmem:[%s317_s1 + $0x10] sm:$0xff]  ;;  %v29_v2 = vld [vmem:[%s317_s1 + $0x8] sm:$0xff]  ;;  %202 = vrcp.f32 %v208_v30 }
   0x2   :  { %55 = vmatpush.msra.mxu0 %v31_v0  ;;  %185 = vmatpush.msra.mxu3 %v31_v0  ;;  %v75_v3 = vld [vmem:[%s318_s3 + $0x38] sm:$0xff]  ;;  %v74_v4 = vld [vmem:[%s318_s3 + $0x30] sm:$0xff]  ;;  %v28_v5 = vld [vmem:[%s317_s1] sm:$0xff] }
   0x3   :  { %95 = vmatpush.msra.mxu1 %v75_v3  ;;  %189 = vmatpush.msra.mxu2 %v75_v3  ;;  %v26_v6 = vld [vmem:[%s319_s0] sm:$0xff]  ;;  %v27_v7 = vld [vmem:[%s319_s0 + $0x8] sm:$0xff]  ;;  %v71_v10 = vld [vmem:[%s318_s3 + $0x18] sm:$0xff] }
   0x4   :  { %56 = vmatpush.msra.mxu0 %v30_v1  ;;  %186 = vmatpush.msra.mxu3 %v30_v1  ;;  %v73_v8 = vld [vmem:[%s318_s3 + $0x28] sm:$0xff]  ;;  %v72_v9 = vld [vmem:[%s318_s3 + $0x20] sm:$0xff]  ;;  %v70_v11 = vld [vmem:[%s318_s3 + $0x10] sm:$0xff] }
   0x5   :  { %96 = vmatpush.msra.mxu1 %v74_v4  ;;  %190 = vmatpush.msra.mxu2 %v74_v4  ;;  %v69_v12 = vld [vmem:[%s318_s3 + $0x8] sm:$0xff]  ;;  %v68_v13 = vld [vmem:[%s318_s3] sm:$0xff] }
   0x6   :  { %57 = vmatpush.msra.mxu0 %v29_v2  ;;  %187 = vmatpush.msra.mxu3 %v29_v2  ;;  %v198_v14 = vld [vmem:[%s320_s2] ss:$0 sm:$0xff] }
   0x7   :  { %97 = vmatpush.msra.mxu1 %v73_v8  ;;  %191 = vmatpush.msra.mxu2 %v73_v8  ;;  %v199_v21 = vld [vmem:[%s321_s4] ss:$0 sm:$0xff]  ;;  %v203_v31 = vpop.eup %202 }
   0x8   :  { %58 = vmatpush.msra.mxu0 %v28_v5  ;;  %188 = vmatpush.msra.mxu3 %v28_v5  ;;  %v119_v32 = vmul.f32 32.0, %v203_v31  ;;  %vm123_vm2 = vweird.f32 %v203_v31  ;;  %v200_v59 = vld [vmem:[%s322_s5] ss:$0 sm:$0xff] }
   0x9   :  { %181 = vmatmul.msk.f32.vlgmr.msra.gmra.mxu0 %vm36_vm0, %v26_v6  ;;  %182 = vmatmul.msk.f32.vlgmr.msra.gmra.mxu3 %vm36_vm0, %v27_v7  ;;  %v201_v62 = vld [vmem:[%s323_s6] ss:$0 sm:$0xff] }
   0xa   :  { %98 = vmatpush.msra.mxu1 %v72_v9  ;;  %192 = vmatpush.msra.mxu2 %v72_v9  ;;  %v120_v33 = vsub.f32 1.0, %v119_v32 }
   0xc   :  { %99 = vmatpush.msra.mxu1 %v71_v10  ;;  %193 = vmatpush.msra.mxu2 %v71_v10  ;;  %v121_v34 = vmul.f32 %v203_v31, %v120_v33 }
   0xe   :  { %100 = vmatpush.msra.mxu1 %v70_v11  ;;  %194 = vmatpush.msra.mxu2 %v70_v11  ;;  %v122_v35 = vadd.f32 %v203_v31, %v121_v34 }
  0x10   :  { %101 = vmatpush.msra.mxu1 %v69_v12  ;;  %195 = vmatpush.msra.mxu2 %v69_v12  ;;  %v124_v36 = vsel %vm123_vm2, %v203_v31, %v122_v35 }
  0x12   :  { %102 = vmatpush.msra.mxu1 %v68_v13  ;;  %196 = vmatpush.msra.mxu2 %v68_v13 }
  0x86   :  { %v60_v15 = vpop.f32.mrf.mxu0 }
  0x87   :  { %v61_v16 = vadd.f32 %v198_v14, %v60_v15 }
  0x89   :  { %v66_v17 = vmax.f32 %v61_v16, 0.0 }
  0x8b   :  { %183 = vmatmul.msk.f32.vlgmr.msra.gmra.mxu1 %vm80_vm1, %v66_v17 }
  0x8c   :  { %v63_v18 = vpop.f32.mrf.mxu3 }
  0x8d   :  { %v64_v19 = vadd.f32 %v198_v14, %v63_v18 }
  0x8f   :  { %v67_v20 = vmax.f32 %v64_v19, 0.0 }
  0x91   :  { %184 = vmatmul.msk.f32.vlgmr.msra.gmra.mxu2 %vm80_vm1, %v67_v20 }
 0x108   :  { %v104_v22 = vpop.f32.mrf.mxu1 }
 0x109   :  { %v105_v23 = vadd.f32 %v199_v21, %v104_v22 }
 0x10b   :  { %v110_v24 = vadd.f32 %v105_v23, %v26_v6 }
 0x10d   :  { %v112_v25 = vsel %vm36_vm0, %v110_v24, 0.0 }
 0x10e   :  { %113 = vadd.xlane.f32.xlu0 %v112_v25 }
 0x114   :  { %v107_v26 = vpop.f32.mrf.mxu2 }
 0x115   :  { %v108_v27 = vadd.f32 %v199_v21, %v107_v26 }
 0x117   :  { %v111_v28 = vadd.f32 %v108_v27, %v27_v7 }
 0x119   :  { %v115_v29 = vsel %vm36_vm0, %v111_v28, 0.0 }
 0x11a   :  { %116 = vadd.xlane.f32.xlu0 %v115_v29 }
 0x181   :  { %v114_v37 = vpop.xlane.xlu0 %113 }
 0x182   :  { %v125_v38 = vmul.f32 %v124_v36, %v114_v37 }
 0x184   :  { %v127_v39 = vsub.f32 %v110_v24, %v125_v38 }
 0x186   :  { %v129_v40 = vmul.f32 %v127_v39, %v127_v39 }
 0x188   :  { %v131_v41 = vsel %vm36_vm0, %v129_v40, 0.0 }
 0x189   :  { %132 = vadd.xlane.f32.xlu1 %v131_v41 }
 0x18d   :  { %v117_v42 = vpop.xlane.xlu0 %116 }
 0x18e   :  { %v126_v43 = vmul.f32 %v124_v36, %v117_v42 }
 0x190   :  { %v128_v44 = vsub.f32 %v111_v28, %v126_v43 }
 0x192   :  { %v130_v45 = vmul.f32 %v128_v44, %v128_v44 }
 0x194   :  { %v134_v46 = vsel %vm36_vm0, %v130_v45, 0.0 }
 0x195   :  { %135 = vadd.xlane.f32.xlu1 %v134_v46 }
 0x1fc   :  { %v133_v47 = vpop.xlane.xlu1 %132 }
 0x1fd   :  { %v137_v48 = vmul.f32 %v133_v47, %v124_v36 }
 0x1ff   :  { %v139_v49 = vadd.f32 1e-05, %v137_v48 }
 0x201   :  { %204 = vrsqrt.f32 %v139_v49  ;;  %vm147_vm4 = vweird.f32 %v139_v49 }
 0x207   :  { %v205_v50 = vpop.eup %204 }
 0x208   :  { %v142_v51 = vmul.f32 %v205_v50, %v139_v49  ;;  %v136_v52 = vpop.xlane.xlu1 %135  ;;  %vm148_vm3 = vweird.f32 %v205_v50 }
 0x209   :  { %v138_v53 = vmul.f32 %v136_v52, %v124_v36  ;;  %vm149_vm5 = vmor %vm147_vm4, %vm148_vm3 }
 0x20a   :  { %v143_v54 = vmul.f32 %v205_v50, %v142_v51 }
 0x20b   :  { %v140_v55 = vadd.f32 1e-05, %v138_v53 }
 0x20c   :  { %v144_v56 = vmul.f32 0.5, %v143_v54 }
 0x20d   :  { %206 = vrsqrt.f32 %v140_v55  ;;  %vm157_vm7 = vweird.f32 %v140_v55 }
 0x20e   :  { %v145_v57 = vsub.f32 1.5, %v144_v56 }
 0x210   :  { %v146_v58 = vmul.f32 %v205_v50, %v145_v57 }
 0x212   :  { %v150_v60 = vsel %vm149_vm5, %v205_v50, %v146_v58 }
 0x213   :  { %v207_v61 = vpop.eup %206  ;;  %v161_v63 = vmul.f32 %v150_v60, %v127_v39 }
 0x214   :  { %v152_v0 = vmul.f32 %v207_v61, %v140_v55  ;;  %vm158_vm6 = vweird.f32 %v207_v61 }
 0x215   :  { %v167_v1 = vmul.f32 %v200_v59, %v161_v63  ;;  %vm159_vm8 = vmor %vm157_vm7, %vm158_vm6 }
 0x216   :  { %v153_v2 = vmul.f32 %v207_v61, %v152_v0 }
 0x217   :  { %v173_v3 = vadd.f32 %v201_v62, %v167_v1 }
 0x218   :  { %v154_v4 = vmul.f32 0.5, %v153_v2 }
 0x219   :  { %175 = vst.msk [vmem:[%s324_s7] sm:$0xff] %vm36_vm0, %v173_v3 }
 0x21a   :  { %v155_v5 = vsub.f32 1.5, %v154_v4 }
 0x21c   :  { %v156_v6 = vmul.f32 %v207_v61, %v155_v5 }
 0x21e   :  { %v160_v7 = vsel %vm159_vm8, %v207_v61, %v156_v6 }
 0x21f   :  { %v162_v8 = vmul.f32 %v160_v7, %v128_v44 }
 0x221   :  { %v168_v9 = vmul.f32 %v200_v59, %v162_v8 }
 0x223   :  { %v174_v10 = vadd.f32 %v201_v62, %v168_v9 }
 0x225   :  { %176 = vst.msk [vmem:[%s324_s7 + $0x8] sm:$0xff] %vm36_vm0, %v174_v10 }

// kernel: transformer_forward.19
= control target key start
LH: loop header
LB: loop body
LE: loop exit
PB: predicated region body
PF: predicated region fallthrough
CT: control target
= control target key end

     0   :  { %vm37_vm0 = vcmask 261120   ;;  %s361_s0 = inlined_call_operand.vmem [shape: f32[16,32], index: 0, kind: input, shape index: {}]   ;;  %s362_s1 = inlined_call_operand.vmem [shape: f32[32,64], index: 1, kind: input, shape index: {}]   ;;  %s363_s2 = inlined_call_operand.vmem [shape: f32[1,64], index: 2, kind: input, shape index: {}]   ;;  %s364_s3 = inlined_call_operand.vmem [shape: f32[64,32], index: 3, kind: input, shape index: {}]   ;;  %s365_s4 = inlined_call_operand.vmem [shape: f32[1,32], index: 4, kind: input, shape index: {}]   ;;  %s366_s5 = inlined_call_operand.vmem [shape: f32[1,32], index: 5, kind: input, shape index: {}]   ;;  %s367_s6 = inlined_call_operand.vmem [shape: f32[1,32], index: 6, kind: input, shape index: {}]   ;;  %s368_s7 = inlined_call_operand.hbm [shape: f32[16,32], index: 7, kind: output, shape index: {}]  }
   0x1   :  { %v32_v0 = vld [vmem:[%s362_s1 + $0x18] sm:$0xff]  ;;  %v31_v1 = vld [vmem:[%s362_s1 + $0x10] sm:$0xff]  ;;  %v30_v2 = vld [vmem:[%s362_s1 + $0x8] sm:$0xff] }
   0x2   :  { %56 = vmatpush.msra.mxu0 %v32_v0  ;;  %200 = vmatpush.msra.mxu3 %v32_v0  ;;  %v76_v3 = vld [vmem:[%s364_s3 + $0x38] sm:$0xff]  ;;  %v29_v4 = vld [vmem:[%s362_s1] sm:$0xff]  ;;  %v75_v5 = vld [vmem:[%s364_s3 + $0x30] sm:$0xff] }
   0x3   :  { %v27_v6 = vld [vmem:[%s361_s0] sm:$0xff]  ;;  %96 = vmatpush.msra.mxu1 %v76_v3  ;;  %204 = vmatpush.msra.mxu2 %v76_v3  ;;  %v28_v7 = vld [vmem:[%s361_s0 + $0x8] sm:$0xff] }
   0x4   :  { %57 = vmatpush.msra.mxu0 %v31_v1  ;;  %201 = vmatpush.msra.mxu3 %v31_v1 }
   0x6   :  { %58 = vmatpush.msra.mxu0 %v30_v2  ;;  %202 = vmatpush.msra.mxu3 %v30_v2 }
   0x7   :  { %12 = vsyncpa [#allocation3], 0  ;;  %97 = vmatpush.msra.mxu1 %v75_v5  ;;  %v74_v8 = vld [vmem:[%s364_s3 + $0x28] sm:$0xff]  ;;  %205 = vmatpush.msra.mxu2 %v75_v5  ;;  %v73_v9 = vld [vmem:[%s364_s3 + $0x20] sm:$0xff]  ;;  %vm81_vm1 = vcmask 523264   ;;  %v252_v30 = vmov 32.0  }
   0x8   :  { %59 = vmatpush.msra.mxu0 %v29_v4  ;;  %203 = vmatpush.msra.mxu3 %v29_v4  ;;  %v72_v10 = vld [vmem:[%s364_s3 + $0x18] sm:$0xff]  ;;  %v71_v11 = vld [vmem:[%s364_s3 + $0x10] sm:$0xff]  ;;  %v70_v12 = vld [vmem:[%s364_s3 + $0x8] sm:$0xff]  ;;  %220 = vrcp.f32 %v252_v30  ;;  %s254_s12 = smov 128   ;;  %s255_s13 = smov 8  }
   0x9   :  { %196 = vmatmul.msk.f32.vlgmr.msra.gmra.mxu0 %vm37_vm0, %v27_v6  ;;  %197 = vmatmul.msk.f32.vlgmr.msra.gmra.mxu3 %vm37_vm0, %v28_v7  ;;  %v69_v13 = vld [vmem:[%s364_s3] sm:$0xff] }
   0xa   :  { %98 = vmatpush.msra.mxu1 %v74_v8  ;;  %206 = vmatpush.msra.mxu2 %v74_v8  ;;  %v216_v14 = vld [vmem:[%s363_s2] ss:$0 sm:$0xff] }
   0xb   :  { %v217_v21 = vld [vmem:[%s365_s4] ss:$0 sm:$0xff] }
   0xc   :  { %99 = vmatpush.msra.mxu1 %v73_v9  ;;  %207 = vmatpush.msra.mxu2 %v73_v9  ;;  %v218_v59 = vld [vmem:[%s366_s5] ss:$0 sm:$0xff]  ;;  %s253_s5 = smov [#allocation2]  }
   0xd   :  { %v219_v63 = vld [vmem:[%s367_s6] ss:$0 sm:$0xff]  ;;  %s182_s9 = sshll.u32 %s253_s5, 4  ;;  %s184_s6 = sshll.u32 %s368_s7, 4  ;;  %s183_s9 = int_to_ptr.vmem [resolvable:$true] %s182_s9  ;;  %s185_s6 = int_to_ptr.hbm [resolvable:$true] %s184_s6 }
   0xe   :  { %100 = vmatpush.msra.mxu1 %v72_v10  ;;  %208 = vmatpush.msra.mxu2 %v72_v10  ;;  %v221_v31 = vpop.eup %220 }
   0xf   :  { %v120_v32 = vmul.f32 32.0, %v221_v31  ;;  %vm124_vm2 = vweird.f32 %v221_v31 }
  0x10   :  { %101 = vmatpush.msra.mxu1 %v71_v11  ;;  %209 = vmatpush.msra.mxu2 %v71_v11 }
  0x11   :  { %v121_v33 = vsub.f32 1.0, %v120_v32 }
  0x12   :  { %102 = vmatpush.msra.mxu1 %v70_v12  ;;  %210 = vmatpush.msra.mxu2 %v70_v12 }
  0x13   :  { %v122_v34 = vmul.f32 %v221_v31, %v121_v33 }
  0x14   :  { %103 = vmatpush.msra.mxu1 %v69_v13  ;;  %211 = vmatpush.msra.mxu2 %v69_v13 }
  0x15   :  { %v123_v35 = vadd.f32 %v221_v31, %v122_v34 }
  0x17   :  { %v125_v36 = vsel %vm124_vm2, %v221_v31, %v123_v35 }
  0x86   :  { %v61_v15 = vpop.f32.mrf.mxu0 }
  0x87   :  { %v62_v16 = vadd.f32 %v216_v14, %v61_v15 }
  0x89   :  { %v67_v17 = vmax.f32 %v62_v16, 0.0 }
  0x8b   :  { %198 = vmatmul.msk.f32.vlgmr.msra.gmra.mxu1 %vm81_vm1, %v67_v17 }
  0x8c   :  { %v64_v18 = vpop.f32.mrf.mxu3 }
  0x8d   :  { %v65_v19 = vadd.f32 %v216_v14, %v64_v18 }
  0x8f   :  { %v68_v20 = vmax.f32 %v65_v19, 0.0 }
  0x91   :  { %199 = vmatmul.msk.f32.vlgmr.msra.gmra.mxu2 %vm81_vm1, %v68_v20 }
 0x108   :  { %v105_v22 = vpop.f32.mrf.mxu1 }
 0x109   :  { %v106_v23 = vadd.f32 %v217_v21, %v105_v22 }
 0x10b   :  { %v111_v24 = vadd.f32 %v106_v23, %v27_v6 }
 0x10d   :  { %v113_v25 = vsel %vm37_vm0, %v111_v24, 0.0 }
 0x10e   :  { %114 = vadd.xlane.f32.xlu0 %v113_v25 }
 0x114   :  { %v108_v26 = vpop.f32.mrf.mxu2 }
 0x115   :  { %v109_v27 = vadd.f32 %v217_v21, %v108_v26 }
 0x117   :  { %v112_v28 = vadd.f32 %v109_v27, %v28_v7 }
 0x119   :  { %v116_v29 = vsel %vm37_vm0, %v112_v28, 0.0 }
 0x11a   :  { %117 = vadd.xlane.f32.xlu0 %v116_v29 }
 0x181   :  { %v115_v37 = vpop.xlane.xlu0 %114 }
 0x182   :  { %v126_v38 = vmul.f32 %v125_v36, %v115_v37 }
 0x184   :  { %v128_v39 = vsub.f32 %v111_v24, %v126_v38 }
 0x186   :  { %v130_v40 = vmul.f32 %v128_v39, %v128_v39 }
 0x188   :  { %v132_v41 = vsel %vm37_vm0, %v130_v40, 0.0 }
 0x189   :  { %133 = vadd.xlane.f32.xlu1 %v132_v41 }
 0x18d   :  { %v118_v42 = vpop.xlane.xlu0 %117 }
 0x18e   :  { %v127_v43 = vmul.f32 %v125_v36, %v118_v42 }
 0x190   :  { %v129_v44 = vsub.f32 %v112_v28, %v127_v43 }
 0x192   :  { %v131_v45 = vmul.f32 %v129_v44, %v129_v44 }
 0x194   :  { %v135_v46 = vsel %vm37_vm0, %v131_v45, 0.0 }
 0x195   :  { %136 = vadd.xlane.f32.xlu1 %v135_v46 }
 0x1fc   :  { %v134_v47 = vpop.xlane.xlu1 %133 }
 0x1fd   :  { %v138_v48 = vmul.f32 %v134_v47, %v125_v36 }
 0x1ff   :  { %v140_v49 = vadd.f32 1e-05, %v138_v48 }
 0x201   :  { %222 = vrsqrt.f32 %v140_v49  ;;  %vm148_vm4 = vweird.f32 %v140_v49 }
 0x207   :  { %v223_v50 = vpop.eup %222 }
 0x208   :  { %v143_v51 = vmul.f32 %v223_v50, %v140_v49  ;;  %v137_v52 = vpop.xlane.xlu1 %136  ;;  %vm149_vm3 = vweird.f32 %v223_v50 }
 0x209   :  { %v139_v53 = vmul.f32 %v137_v52, %v125_v36  ;;  %vm150_vm5 = vmor %vm148_vm4, %vm149_vm3 }
 0x20a   :  { %v144_v54 = vmul.f32 %v223_v50, %v143_v51 }
 0x20b   :  { %v141_v55 = vadd.f32 1e-05, %v139_v53 }
 0x20c   :  { %v145_v56 = vmul.f32 0.5, %v144_v54 }
 0x20d   :  { %224 = vrsqrt.f32 %v141_v55  ;;  %vm158_vm7 = vweird.f32 %v141_v55 }
 0x20e   :  { %v146_v57 = vsub.f32 1.5, %v145_v56 }
 0x210   :  { %v147_v58 = vmul.f32 %v223_v50, %v146_v57 }
 0x212   :  { %v151_v60 = vsel %vm150_vm5, %v223_v50, %v147_v58 }
 0x213   :  { %v225_v61 = vpop.eup %224  ;;  %v162_v62 = vmul.f32 %v151_v60, %v128_v39 }
 0x214   :  { %v153_v0 = vmul.f32 %v225_v61, %v141_v55  ;;  %vm159_vm6 = vweird.f32 %v225_v61 }
 0x215   :  { %v168_v1 = vmul.f32 %v218_v59, %v162_v62  ;;  %vm160_vm8 = vmor %vm158_vm7, %vm159_vm6 }
 0x216   :  { %v154_v2 = vmul.f32 %v225_v61, %v153_v0 }
 0x217   :  { %v174_v3 = vadd.f32 %v219_v63, %v168_v1 }
 0x218   :  { %v155_v4 = vmul.f32 0.5, %v154_v2 }
 0x219   :  { %176 = vst.msk [vmem:[#allocation2] sm:$0xff] %vm37_vm0, %v174_v3 }
 0x21a   :  { %v156_v5 = vsub.f32 1.5, %v155_v4 }
 0x21c   :  { %v157_v6 = vmul.f32 %v225_v61, %v156_v5 }
 0x21e   :  { %v161_v7 = vsel %vm160_vm8, %v225_v61, %v157_v6 }
 0x21f   :  { %v163_v8 = vmul.f32 %v161_v7, %v129_v44 }
 0x221   :  { %v169_v9 = vmul.f32 %v218_v59, %v163_v8 }
 0x223   :  { %v175_v10 = vadd.f32 %v219_v63, %v169_v9 }
 0x225   :  { %177 = vst.msk [vmem:[#allocation2 + $0x8] sm:$0xff] %vm37_vm0, %v175_v10 }
 0x226   :  { %190 = dma.vmem_to_hbm [thread:$0]  %s183_s9, 256, %s185_s6, [#allocation3], %s254_s12, %s254_s12, %s255_s13  }
 0x227   :  { %250 = dma.done.wait [#allocation3], 256  }
 0x228   :  { %251 = vsyncadd [#allocation3], 4294967040 }
 0x229   :  { %195 = vsyncpa [#allocation3], 1 }

</bundles_post_ra>
